<compile_context>
chip_gen: v6e
topology: v6e:2x2x1
jax: 0.10.0
libtpu: 0.0.40
codegen_flags: <defaults>
</compile_context>

<pallas_src>
import math

import jax
import jax.numpy as jnp
from jax.experimental import pallas as pl
from jax.experimental.pallas import tpu as pltpu

# ---------------- synthetic-BERT config (small) ----------------
VOCAB = 100
MAX_POS = 32
HIDDEN = 32          # "in_size" for the classifier head
N_HEADS = 2
HEAD_DIM = HIDDEN // N_HEADS
N_LAYERS = 2
FFN = 64
OUT_SIZE = 3         # "out_size"
LN_EPS = 1e-12

# packed-blob layout constants
VEC_W = 3 * HIDDEN          # width of the per-layer bias/LN vector blob (96)
CLS_PAD = 128               # lane-dense classifier width
POS_OFF = 0                 # rows of the embedding blob
WORD_OFF = MAX_POS
TYPE_OFF = MAX_POS + VOCAB
EMB_G_OFF = TYPE_OFF + 1
EMB_B_OFF = EMB_G_OFF + 1
# rows of the per-layer vector blob
ROW_BQKV, ROW_BO, ROW_LN1G, ROW_LN1B, ROW_B1, ROW_B2, ROW_LN2G, ROW_LN2B = range(8)


# ---------------- fused whole-model Pallas kernel (one grid step = one sequence) ----------------

def _bert_kernel(ids_ref, mask_ref, emb_ref, wa_ref, w2_ref, vec_ref,
                 clsw_ref, clsb_ref, out_ref):
    f32, bf16 = jnp.float32, jnp.bfloat16
    S = ids_ref.shape[0]
    scale = 1.0 / math.sqrt(HEAD_DIM)
    gelu_c = math.sqrt(2.0 / math.pi)

    def layernorm(x, g, b):
        mean = jnp.mean(x, axis=-1, keepdims=True)
        xc = x - mean
        var = jnp.mean(xc * xc, axis=-1, keepdims=True)
        return xc * jax.lax.rsqrt(var + LN_EPS) * g + b

    def mm(a, w):
        # bf16 MXU operands, f32 accumulation; elementwise math stays f32.
        return jnp.dot(a.astype(bf16), w.astype(bf16), preferred_element_type=f32)

    # ---- embeddings: exact one-hot gather (f32 matmul) + pos + token-type, LayerNorm ----
    ids = ids_ref[...]                                                    # (S, 1) int32
    onehot = (ids == jax.lax.broadcasted_iota(jnp.int32, (S, VOCAB), 1)).astype(f32)
    tok = jnp.dot(onehot, emb_ref[WORD_OFF:WORD_OFF + VOCAB, :],
                  preferred_element_type=f32)                             # (S, H) exact gather
    x = tok + emb_ref[POS_OFF:POS_OFF + S, :] + emb_ref[TYPE_OFF:TYPE_OFF + 1, :]
    x = layernorm(x, emb_ref[EMB_G_OFF:EMB_G_OFF + 1, :],
                  emb_ref[EMB_B_OFF:EMB_B_OFF + 1, :])                    # (S, H) f32

    # additive attention-mask bias, computed in-kernel, kept in f32
    bias = (1.0 - mask_ref[...].astype(f32)) * -1e9                       # (1, S)

    # TODO(synk): at real bert-base-cased scale (H=768, 12 layers) the stacked
    # weights would not fit VMEM-resident (v7x: 64 MiB); add a layer grid axis
    # ("arbitrary") streaming wa/w2/vec blocks + vmem_limit_bytes instead.
    for l in range(N_LAYERS):                                             # static unroll
        wqkv = wa_ref[l, :, 0:3 * HIDDEN]
        wo   = wa_ref[l, :, 3 * HIDDEN:4 * HIDDEN]
        w1   = wa_ref[l, :, 4 * HIDDEN:4 * HIDDEN + FFN]
        w2   = w2_ref[l]

        # fused QKV projection: one MXU pass over 3H lanes
        qkv = mm(x, wqkv) + vec_ref[l, ROW_BQKV:ROW_BQKV + 1, :]          # (S, 3H)

        # All heads, each head's context folded straight into the output
        # projection (no concat / no transpose).  NOTE: HEAD_DIM=16 < 128 lanes
        # so any per-head layout is lane-sparse; at this toy size the kernel is
        # dispatch/DMA-bound and these static 16-lane slices are negligible.
        attn = jnp.zeros((S, HIDDEN), f32)
        for h in range(N_HEADS):                                          # static unroll
            off = h * HEAD_DIM
            qh = qkv[:, off:off + HEAD_DIM]
            kh = qkv[:, HIDDEN + off:HIDDEN + off + HEAD_DIM]
            vh = qkv[:, 2 * HIDDEN + off:2 * HIDDEN + off + HEAD_DIM]
            s = jnp.einsum("qd,kd->qk", qh.astype(bf16), kh.astype(bf16),
                           preferred_element_type=f32) * scale + bias     # (S, S) f32
            m = jnp.max(s, axis=-1, keepdims=True)
            p = jnp.exp(s - m)
            p = p * pl.reciprocal(jnp.sum(p, axis=-1, keepdims=True), approx=True)
            ctx = mm(p, vh)                                               # (S, HD)
            attn = attn + mm(ctx, wo[off:off + HEAD_DIM, :])
        attn = attn + vec_ref[l, ROW_BO:ROW_BO + 1, 0:HIDDEN]
        x = layernorm(x + attn,
                      vec_ref[l, ROW_LN1G:ROW_LN1G + 1, 0:HIDDEN],
                      vec_ref[l, ROW_LN1B:ROW_LN1B + 1, 0:HIDDEN])

        # FFN — tanh-approx GELU, all elementwise in f32.
        # TODO(synk): HF bert-base-cased uses exact erf GELU; tanh approximation used here.
        h1 = mm(x, w1) + vec_ref[l, ROW_B1:ROW_B1 + 1, 0:FFN]
        h1 = 0.5 * h1 * (1.0 + jnp.tanh(gelu_c * (h1 + 0.044715 * h1 * h1 * h1)))
        h2 = mm(h1, w2) + vec_ref[l, ROW_B2:ROW_B2 + 1, 0:HIDDEN]
        x = layernorm(x + h2,
                      vec_ref[l, ROW_LN2G:ROW_LN2G + 1, 0:HIDDEN],
                      vec_ref[l, ROW_LN2B:ROW_LN2B + 1, 0:HIDDEN])

    # torch.mean(last_hidden_state, dim=1) -> Linear -> Sigmoid
    # (mean intentionally includes padded positions, matching the torch.mean reference)
    pooled = jnp.mean(x, axis=0, keepdims=True)                           # (1, H)
    logits = mm(pooled, clsw_ref[...]) + clsb_ref[...]                    # (1, 128) lane-dense
    out_ref[...] = 1.0 / (1.0 + jnp.exp(-logits))                         # exact sigmoid


def my_bert_model(params, inputs, masks):
    B, S = inputs.shape
    # Metadata-only reshapes; all real work (gather, bias, encoder, head) is in the kernel.
    ids = inputs.reshape(B, S, 1).astype(jnp.int32)
    msk = masks.reshape(B, 1, S).astype(jnp.int32)

    emb, wa, w2, vec = params["emb"], params["wa"], params["w2"], params["vec"]
    cls_w, cls_b = params["cls_w"], params["cls_b"]

    out = pl.pallas_call(
        _bert_kernel,
        grid=(B,),                                           # batch-parallel grid (v7x: 2 TCs)
        out_shape=jax.ShapeDtypeStruct((B, 1, CLS_PAD), jnp.float32),
        in_specs=[
            pl.BlockSpec((None, S, 1), lambda b: (b, 0, 0)),   # token ids
            pl.BlockSpec((None, 1, S), lambda b: (b, 0, 0)),   # attention mask
            pl.BlockSpec(emb.shape, lambda b: (0, 0)),         # embedding / emb-LN blob (f32)
            pl.BlockSpec(wa.shape, lambda b: (0, 0, 0)),       # [wqkv|wo|w1] per layer (bf16)
            pl.BlockSpec(w2.shape, lambda b: (0, 0, 0)),       # w2 per layer (bf16)
            pl.BlockSpec(vec.shape, lambda b: (0, 0, 0)),      # bias / LN vector blob (f32)
            pl.BlockSpec(cls_w.shape, lambda b: (0, 0)),       # classifier W, lane-padded (bf16)
            pl.BlockSpec(cls_b.shape, lambda b: (0, 0)),       # classifier b, lane-padded (f32)
        ],
        out_specs=pl.BlockSpec((None, 1, CLS_PAD), lambda b: (b, 0, 0)),
        compiler_params=pltpu.CompilerParams(dimension_semantics=("parallel",)),
    )(ids, msk, emb, wa, w2, vec, cls_w, cls_b)
    return out[:, 0, :OUT_SIZE]


# ---------------- deterministic parameter init + packing ----------------

def pack_params(raw):
    """Pack 19 tiny tensors into 6 VMEM blobs (fewer input DMAs per call)."""
    emb = jnp.concatenate(
        [raw["pos_emb"], raw["word_emb"], raw["type_emb"][:1],
         raw["emb_ln_g"], raw["emb_ln_b"]], axis=0).astype(jnp.float32)        # (135, H)

    wa = jnp.concatenate([raw["wqkv"], raw["wo"], raw["w1"]],
                         axis=-1).astype(jnp.bfloat16)                          # (L, H, 6H)
    w2 = raw["w2"].astype(jnp.bfloat16)                                         # (L, FFN, H)

    def row(v):  # (L, W) -> (L, 1, VEC_W), zero-padded on lanes
        return jnp.pad(v, ((0, 0), (0, VEC_W - v.shape[-1])))[:, None, :]

    vec = jnp.concatenate(
        [row(raw["bqkv"]), row(raw["bo"]), row(raw["ln1_g"]), row(raw["ln1_b"]),
         row(raw["b1"]), row(raw["b2"]), row(raw["ln2_g"]), row(raw["ln2_b"])],
        axis=1).astype(jnp.float32)                                             # (L, 8, VEC_W)

    cls_w = (jnp.zeros((HIDDEN, CLS_PAD), jnp.float32)
             .at[:, :OUT_SIZE].set(raw["cls_w"]).astype(jnp.bfloat16))          # (H, 128)
    cls_b = jnp.zeros((1, CLS_PAD), jnp.float32).at[0, :OUT_SIZE].set(raw["cls_b"])

    return {"emb": emb, "wa": wa, "w2": w2, "vec": vec, "cls_w": cls_w, "cls_b": cls_b}


def init_params(key):
    keys = iter(jax.random.split(key, 16))

    def nrm(shape, scale=0.02):
        return scale * jax.random.normal(next(keys), shape, dtype=jnp.float32)

    raw = {
        "word_emb": nrm((VOCAB, HIDDEN)),
        "pos_emb": nrm((MAX_POS, HIDDEN)),
        "type_emb": nrm((2, HIDDEN)),
        "emb_ln_g": jnp.ones((1, HIDDEN), jnp.float32),
        "emb_ln_b": jnp.zeros((1, HIDDEN), jnp.float32),
        "wqkv": nrm((N_LAYERS, HIDDEN, 3 * HIDDEN)),
        "bqkv": jnp.zeros((N_LAYERS, 3 * HIDDEN), jnp.float32),
        "wo": nrm((N_LAYERS, HIDDEN, HIDDEN)),
        "bo": jnp.zeros((N_LAYERS, HIDDEN), jnp.float32),
        "ln1_g": jnp.ones((N_LAYERS, HIDDEN), jnp.float32),
        "ln1_b": jnp.zeros((N_LAYERS, HIDDEN), jnp.float32),
        "w1": nrm((N_LAYERS, HIDDEN, FFN)),
        "b1": jnp.zeros((N_LAYERS, FFN), jnp.float32),
        "w2": nrm((N_LAYERS, FFN, HIDDEN)),
        "b2": jnp.zeros((N_LAYERS, HIDDEN), jnp.float32),
        "ln2_g": jnp.ones((N_LAYERS, HIDDEN), jnp.float32),
        "ln2_b": jnp.zeros((N_LAYERS, HIDDEN), jnp.float32),
        "cls_w": nrm((HIDDEN, OUT_SIZE)),
        "cls_b": jnp.zeros((OUT_SIZE,), jnp.float32),
    }
    return pack_params(raw)


if __name__ == "__main__":
    key = jax.random.PRNGKey(0)
    pkey, ikey = jax.random.split(key)

    params = init_params(pkey)

    B, S = 2, 8
    inputs = jax.random.randint(ikey, (B, S), 0, VOCAB, dtype=jnp.int32)
    masks = jnp.ones((B, S), dtype=jnp.int32).at[1, 6:].set(0)   # pad tail of 2nd example

    # TODO(synk): loading real 'bert-base-cased' pretrained weights has no
    # in-script equivalent; weights are synthetic/deterministic.
    out = jax.jit(my_bert_model)(params, inputs, masks)
    out = jax.block_until_ready(out)
    assert out.shape == (B, OUT_SIZE)
    assert bool(jnp.all(jnp.isfinite(out)))
    assert bool(jnp.all((out > 0.0) & (out < 1.0)))
    print("KERNEL_OK")
</pallas_src>

<mosaic_0001>
module attributes {stable_mosaic.version = 11 : i64} {
  func.func @_bert_kernel(%arg0: i32, %arg1: memref<1x8x1xi32, #tpu.memory_space<vmem>>, %arg2: memref<1x1x8xi32, #tpu.memory_space<vmem>>, %arg3: memref<135x32xf32, #tpu.memory_space<vmem>>, %arg4: memref<2x32x192xbf16, #tpu.memory_space<vmem>>, %arg5: memref<2x64x32xbf16, #tpu.memory_space<vmem>>, %arg6: memref<2x8x96xf32, #tpu.memory_space<vmem>>, %arg7: memref<32x128xbf16, #tpu.memory_space<vmem>>, %arg8: memref<1x128xf32, #tpu.memory_space<vmem>>, %arg9: memref<1x1x128xf32, #tpu.memory_space<vmem>>) attributes {dimension_semantics = [#tpu.dimension_semantics<parallel>], iteration_bounds = array<i64: 2>, scalar_prefetch = 0 : i64, scratch_operands = 0 : i64, tpu.core_type = #tpu.core_type<tc>, window_params = [{transform_indices = @transform_0, window_bounds = array<i64: 1, 8, 1>}, {transform_indices = @transform_1, window_bounds = array<i64: 1, 1, 8>}, {pipeline_mode = #tpu.pipeline_mode<synchronous>, transform_indices = @transform_2, window_bounds = array<i64: 135, 32>}, {pipeline_mode = #tpu.pipeline_mode<synchronous>, transform_indices = @transform_3, window_bounds = array<i64: 2, 32, 192>}, {pipeline_mode = #tpu.pipeline_mode<synchronous>, transform_indices = @transform_4, window_bounds = array<i64: 2, 64, 32>}, {pipeline_mode = #tpu.pipeline_mode<synchronous>, transform_indices = @transform_5, window_bounds = array<i64: 2, 8, 96>}, {pipeline_mode = #tpu.pipeline_mode<synchronous>, transform_indices = @transform_6, window_bounds = array<i64: 32, 128>}, {pipeline_mode = #tpu.pipeline_mode<synchronous>, transform_indices = @transform_7, window_bounds = array<i64: 1, 128>}, {transform_indices = @transform_8, window_bounds = array<i64: 1, 1, 128>}]} {
    %c0 = arith.constant 0 : index
    %c0_0 = arith.constant 0 : index
    %c0_1 = arith.constant 0 : index
    %0 = vector.load %arg1[%c0, %c0_0, %c0_1] : memref<1x8x1xi32, #tpu.memory_space<vmem>>, vector<1x8x1xi32>
    %1 = vector.shape_cast %0 : vector<1x8x1xi32> to vector<8x1xi32>
    %2 = tpu.iota {dimensions = array<i32: 1>} : vector<8x100xi32>
    %3 = vector.broadcast %1 : vector<8x1xi32> to vector<8x100xi32>
    %4 = arith.cmpi eq, %3, %2 : vector<8x100xi32>
    %5 = arith.extui %4 : vector<8x100xi1> to vector<8x100xi32>
    %6 = arith.sitofp %5 : vector<8x100xi32> to vector<8x100xf32>
    %c32 = arith.constant 32 : index
    %c0_2 = arith.constant 0 : index
    %7 = vector.load %arg3[%c32, %c0_2] : memref<135x32xf32, #tpu.memory_space<vmem>>, vector<100x32xf32>
    %cst = arith.constant dense<0.000000e+00> : vector<8x32xf32>
    %8 = tpu.matmul %6, %7, %cst {dimension_numbers = #tpu.dot_dimension_numbers<[1], [0], [0], [1], [0, 0, 1, 1], [], []>} : vector<8x100xf32>, vector<100x32xf32>, vector<8x32xf32> -> vector<8x32xf32>
    %c0_3 = arith.constant 0 : index
    %c0_4 = arith.constant 0 : index
    %9 = vector.load %arg3[%c0_3, %c0_4] : memref<135x32xf32, #tpu.memory_space<vmem>>, vector<8x32xf32>
    %10 = arith.addf %8, %9 : vector<8x32xf32>
    %c132 = arith.constant 132 : index
    %c0_5 = arith.constant 0 : index
    %11 = vector.load %arg3[%c132, %c0_5] : memref<135x32xf32, #tpu.memory_space<vmem>>, vector<1x32xf32>
    %12 = vector.broadcast %11 : vector<1x32xf32> to vector<8x32xf32>
    %13 = arith.addf %10, %12 : vector<8x32xf32>
    %c133 = arith.constant 133 : index
    %c0_6 = arith.constant 0 : index
    %14 = vector.load %arg3[%c133, %c0_6] : memref<135x32xf32, #tpu.memory_space<vmem>>, vector<1x32xf32>
    %c134 = arith.constant 134 : index
    %c0_7 = arith.constant 0 : index
    %15 = vector.load %arg3[%c134, %c0_7] : memref<135x32xf32, #tpu.memory_space<vmem>>, vector<1x32xf32>
    %cst_8 = arith.constant dense<0.000000e+00> : vector<8xf32>
    %16 = vector.multi_reduction <add>, %13, %cst_8 [1] : vector<8x32xf32> to vector<8xf32>
    %17 = vector.shape_cast %16 : vector<8xf32> to vector<8x1xf32>
    %cst_9 = arith.constant 3.200000e+01 : f32
    %18 = vector.broadcast %cst_9 : f32 to vector<8x1xf32>
    %19 = arith.divf %17, %18 : vector<8x1xf32>
    %20 = vector.broadcast %19 : vector<8x1xf32> to vector<8x32xf32>
    %21 = arith.subf %13, %20 : vector<8x32xf32>
    %22 = arith.mulf %21, %21 : vector<8x32xf32>
    %cst_10 = arith.constant dense<0.000000e+00> : vector<8xf32>
    %23 = vector.multi_reduction <add>, %22, %cst_10 [1] : vector<8x32xf32> to vector<8xf32>
    %24 = vector.shape_cast %23 : vector<8xf32> to vector<8x1xf32>
    %cst_11 = arith.constant 3.200000e+01 : f32
    %25 = vector.broadcast %cst_11 : f32 to vector<8x1xf32>
    %26 = arith.divf %24, %25 : vector<8x1xf32>
    %cst_12 = arith.constant 9.99999996E-13 : f32
    %27 = vector.broadcast %cst_12 : f32 to vector<8x1xf32>
    %28 = arith.addf %26, %27 : vector<8x1xf32>
    %29 = math.rsqrt %28 : vector<8x1xf32>
    %30 = vector.broadcast %29 : vector<8x1xf32> to vector<8x32xf32>
    %31 = arith.mulf %21, %30 : vector<8x32xf32>
    %32 = vector.broadcast %14 : vector<1x32xf32> to vector<8x32xf32>
    %33 = arith.mulf %31, %32 : vector<8x32xf32>
    %34 = vector.broadcast %15 : vector<1x32xf32> to vector<8x32xf32>
    %35 = arith.addf %33, %34 : vector<8x32xf32>
    %c0_13 = arith.constant 0 : index
    %c0_14 = arith.constant 0 : index
    %c0_15 = arith.constant 0 : index
    %36 = vector.load %arg2[%c0_13, %c0_14, %c0_15] : memref<1x1x8xi32, #tpu.memory_space<vmem>>, vector<1x1x8xi32>
    %37 = vector.shape_cast %36 : vector<1x1x8xi32> to vector<1x8xi32>
    %38 = arith.sitofp %37 : vector<1x8xi32> to vector<1x8xf32>
    %cst_16 = arith.constant 1.000000e+00 : f32
    %39 = vector.broadcast %cst_16 : f32 to vector<1x8xf32>
    %40 = arith.subf %39, %38 : vector<1x8xf32>
    %cst_17 = arith.constant -1.000000e+09 : f32
    %41 = vector.broadcast %cst_17 : f32 to vector<1x8xf32>
    %42 = arith.mulf %40, %41 : vector<1x8xf32>
    %c0_18 = arith.constant 0 : index
    %c0_19 = arith.constant 0 : index
    %c0_20 = arith.constant 0 : index
    %43 = vector.load %arg4[%c0_18, %c0_19, %c0_20] : memref<2x32x192xbf16, #tpu.memory_space<vmem>>, vector<1x32x96xbf16>
    %44 = vector.shape_cast %43 : vector<1x32x96xbf16> to vector<32x96xbf16>
    %c0_21 = arith.constant 0 : index
    %c0_22 = arith.constant 0 : index
    %c96 = arith.constant 96 : index
    %45 = vector.load %arg4[%c0_21, %c0_22, %c96] : memref<2x32x192xbf16, #tpu.memory_space<vmem>>, vector<1x32x32xbf16>
    %46 = vector.shape_cast %45 : vector<1x32x32xbf16> to vector<32x32xbf16>
    %c0_23 = arith.constant 0 : index
    %c0_24 = arith.constant 0 : index
    %c128 = arith.constant 128 : index
    %47 = vector.load %arg4[%c0_23, %c0_24, %c128] : memref<2x32x192xbf16, #tpu.memory_space<vmem>>, vector<1x32x64xbf16>
    %48 = vector.shape_cast %47 : vector<1x32x64xbf16> to vector<32x64xbf16>
    %c0_25 = arith.constant 0 : index
    %c0_26 = arith.constant 0 : index
    %c0_27 = arith.constant 0 : index
    %49 = vector.load %arg5[%c0_25, %c0_26, %c0_27] : memref<2x64x32xbf16, #tpu.memory_space<vmem>>, vector<1x64x32xbf16>
    %50 = vector.shape_cast %49 : vector<1x64x32xbf16> to vector<64x32xbf16>
    %51 = arith.truncf %35 : vector<8x32xf32> to vector<8x32xbf16>
    %cst_28 = arith.constant dense<0.000000e+00> : vector<8x96xf32>
    %52 = tpu.matmul %51, %44, %cst_28 {dimension_numbers = #tpu.dot_dimension_numbers<[1], [0], [0], [1], [0, 0, 1, 1], [], []>} : vector<8x32xbf16>, vector<32x96xbf16>, vector<8x96xf32> -> vector<8x96xf32>
    %c0_29 = arith.constant 0 : index
    %c0_30 = arith.constant 0 : index
    %c0_31 = arith.constant 0 : index
    %53 = vector.load %arg6[%c0_29, %c0_30, %c0_31] : memref<2x8x96xf32, #tpu.memory_space<vmem>>, vector<1x1x96xf32>
    %54 = vector.shape_cast %53 : vector<1x1x96xf32> to vector<1x96xf32>
    %55 = vector.broadcast %54 : vector<1x96xf32> to vector<8x96xf32>
    %56 = arith.addf %52, %55 : vector<8x96xf32>
    %cst_32 = arith.constant 0.000000e+00 : f32
    %57 = vector.broadcast %cst_32 : f32 to vector<8x32xf32>
    %58 = vector.extract_strided_slice %56 {offsets = [0, 0], sizes = [8, 16], strides = [1, 1]} : vector<8x96xf32> to vector<8x16xf32>
    %59 = vector.extract_strided_slice %56 {offsets = [0, 32], sizes = [8, 16], strides = [1, 1]} : vector<8x96xf32> to vector<8x16xf32>
    %60 = vector.extract_strided_slice %56 {offsets = [0, 64], sizes = [8, 16], strides = [1, 1]} : vector<8x96xf32> to vector<8x16xf32>
    %61 = arith.truncf %58 : vector<8x16xf32> to vector<8x16xbf16>
    %62 = arith.truncf %59 : vector<8x16xf32> to vector<8x16xbf16>
    "tpu.trace_start"() <{level = 10 : i32, message = "qd,kd->qk"}> : () -> ()
    %cst_33 = arith.constant dense<0.000000e+00> : vector<8x8xf32>
    %63 = tpu.matmul %61, %62, %cst_33 {dimension_numbers = #tpu.dot_dimension_numbers<[1], [1], [0], [0], [0, 0, 1, 0], [], []>} : vector<8x16xbf16>, vector<8x16xbf16>, vector<8x8xf32> -> vector<8x8xf32>
    "tpu.trace_stop"() : () -> ()
    %cst_34 = arith.constant 2.500000e-01 : f32
    %64 = vector.broadcast %cst_34 : f32 to vector<8x8xf32>
    %65 = arith.mulf %63, %64 : vector<8x8xf32>
    %66 = vector.broadcast %42 : vector<1x8xf32> to vector<8x8xf32>
    %67 = arith.addf %65, %66 : vector<8x8xf32>
    %cst_35 = arith.constant dense<0xFF800000> : vector<8xf32>
    %68 = vector.multi_reduction <maximumf>, %67, %cst_35 [1] : vector<8x8xf32> to vector<8xf32>
    %69 = vector.shape_cast %68 : vector<8xf32> to vector<8x1xf32>
    %70 = vector.broadcast %69 : vector<8x1xf32> to vector<8x8xf32>
    %71 = arith.subf %67, %70 : vector<8x8xf32>
    %72 = math.exp %71 : vector<8x8xf32>
    %cst_36 = arith.constant dense<0.000000e+00> : vector<8xf32>
    %73 = vector.multi_reduction <add>, %72, %cst_36 [1] : vector<8x8xf32> to vector<8xf32>
    %74 = vector.shape_cast %73 : vector<8xf32> to vector<8x1xf32>
    %75 = tpu.reciprocal %74 {approx = true} : vector<8x1xf32> -> vector<8x1xf32>
    %76 = vector.broadcast %75 : vector<8x1xf32> to vector<8x8xf32>
    %77 = arith.mulf %72, %76 : vector<8x8xf32>
    %78 = arith.truncf %77 : vector<8x8xf32> to vector<8x8xbf16>
    %79 = arith.truncf %60 : vector<8x16xf32> to vector<8x16xbf16>
    %cst_37 = arith.constant dense<0.000000e+00> : vector<8x16xf32>
    %80 = tpu.matmul %78, %79, %cst_37 {dimension_numbers = #tpu.dot_dimension_numbers<[1], [0], [0], [1], [0, 0, 1, 1], [], []>} : vector<8x8xbf16>, vector<8x16xbf16>, vector<8x16xf32> -> vector<8x16xf32>
    %81 = vector.extract_strided_slice %46 {offsets = [0, 0], sizes = [16, 32], strides = [1, 1]} : vector<32x32xbf16> to vector<16x32xbf16>
    %82 = arith.truncf %80 : vector<8x16xf32> to vector<8x16xbf16>
    %cst_38 = arith.constant dense<0.000000e+00> : vector<8x32xf32>
    %83 = tpu.matmul %82, %81, %cst_38 {dimension_numbers = #tpu.dot_dimension_numbers<[1], [0], [0], [1], [0, 0, 1, 1], [], []>} : vector<8x16xbf16>, vector<16x32xbf16>, vector<8x32xf32> -> vector<8x32xf32>
    %84 = arith.addf %57, %83 : vector<8x32xf32>
    %85 = vector.extract_strided_slice %56 {offsets = [0, 16], sizes = [8, 16], strides = [1, 1]} : vector<8x96xf32> to vector<8x16xf32>
    %86 = vector.extract_strided_slice %56 {offsets = [0, 48], sizes = [8, 16], strides = [1, 1]} : vector<8x96xf32> to vector<8x16xf32>
    %87 = vector.extract_strided_slice %56 {offsets = [0, 80], sizes = [8, 16], strides = [1, 1]} : vector<8x96xf32> to vector<8x16xf32>
    %88 = arith.truncf %85 : vector<8x16xf32> to vector<8x16xbf16>
    %89 = arith.truncf %86 : vector<8x16xf32> to vector<8x16xbf16>
    "tpu.trace_start"() <{level = 10 : i32, message = "qd,kd->qk"}> : () -> ()
    %cst_39 = arith.constant dense<0.000000e+00> : vector<8x8xf32>
    %90 = tpu.matmul %88, %89, %cst_39 {dimension_numbers = #tpu.dot_dimension_numbers<[1], [1], [0], [0], [0, 0, 1, 0], [], []>} : vector<8x16xbf16>, vector<8x16xbf16>, vector<8x8xf32> -> vector<8x8xf32>
    "tpu.trace_stop"() : () -> ()
    %cst_40 = arith.constant 2.500000e-01 : f32
    %91 = vector.broadcast %cst_40 : f32 to vector<8x8xf32>
    %92 = arith.mulf %90, %91 : vector<8x8xf32>
    %93 = vector.broadcast %42 : vector<1x8xf32> to vector<8x8xf32>
    %94 = arith.addf %92, %93 : vector<8x8xf32>
    %cst_41 = arith.constant dense<0xFF800000> : vector<8xf32>
    %95 = vector.multi_reduction <maximumf>, %94, %cst_41 [1] : vector<8x8xf32> to vector<8xf32>
    %96 = vector.shape_cast %95 : vector<8xf32> to vector<8x1xf32>
    %97 = vector.broadcast %96 : vector<8x1xf32> to vector<8x8xf32>
    %98 = arith.subf %94, %97 : vector<8x8xf32>
    %99 = math.exp %98 : vector<8x8xf32>
    %cst_42 = arith.constant dense<0.000000e+00> : vector<8xf32>
    %100 = vector.multi_reduction <add>, %99, %cst_42 [1] : vector<8x8xf32> to vector<8xf32>
    %101 = vector.shape_cast %100 : vector<8xf32> to vector<8x1xf32>
    %102 = tpu.reciprocal %101 {approx = true} : vector<8x1xf32> -> vector<8x1xf32>
    %103 = vector.broadcast %102 : vector<8x1xf32> to vector<8x8xf32>
    %104 = arith.mulf %99, %103 : vector<8x8xf32>
    %105 = arith.truncf %104 : vector<8x8xf32> to vector<8x8xbf16>
    %106 = arith.truncf %87 : vector<8x16xf32> to vector<8x16xbf16>
    %cst_43 = arith.constant dense<0.000000e+00> : vector<8x16xf32>
    %107 = tpu.matmul %105, %106, %cst_43 {dimension_numbers = #tpu.dot_dimension_numbers<[1], [0], [0], [1], [0, 0, 1, 1], [], []>} : vector<8x8xbf16>, vector<8x16xbf16>, vector<8x16xf32> -> vector<8x16xf32>
    %108 = vector.extract_strided_slice %46 {offsets = [16, 0], sizes = [16, 32], strides = [1, 1]} : vector<32x32xbf16> to vector<16x32xbf16>
    %109 = arith.truncf %107 : vector<8x16xf32> to vector<8x16xbf16>
    %cst_44 = arith.constant dense<0.000000e+00> : vector<8x32xf32>
    %110 = tpu.matmul %109, %108, %cst_44 {dimension_numbers = #tpu.dot_dimension_numbers<[1], [0], [0], [1], [0, 0, 1, 1], [], []>} : vector<8x16xbf16>, vector<16x32xbf16>, vector<8x32xf32> -> vector<8x32xf32>
    %111 = arith.addf %84, %110 : vector<8x32xf32>
    %c0_45 = arith.constant 0 : index
    %c1 = arith.constant 1 : index
    %c0_46 = arith.constant 0 : index
    %112 = vector.load %arg6[%c0_45, %c1, %c0_46] : memref<2x8x96xf32, #tpu.memory_space<vmem>>, vector<1x1x32xf32>
    %113 = vector.shape_cast %112 : vector<1x1x32xf32> to vector<1x32xf32>
    %114 = vector.broadcast %113 : vector<1x32xf32> to vector<8x32xf32>
    %115 = arith.addf %111, %114 : vector<8x32xf32>
    %116 = arith.addf %35, %115 : vector<8x32xf32>
    %c0_47 = arith.constant 0 : index
    %c2 = arith.constant 2 : index
    %c0_48 = arith.constant 0 : index
    %117 = vector.load %arg6[%c0_47, %c2, %c0_48] : memref<2x8x96xf32, #tpu.memory_space<vmem>>, vector<1x1x32xf32>
    %118 = vector.shape_cast %117 : vector<1x1x32xf32> to vector<1x32xf32>
    %c0_49 = arith.constant 0 : index
    %c3 = arith.constant 3 : index
    %c0_50 = arith.constant 0 : index
    %119 = vector.load %arg6[%c0_49, %c3, %c0_50] : memref<2x8x96xf32, #tpu.memory_space<vmem>>, vector<1x1x32xf32>
    %120 = vector.shape_cast %119 : vector<1x1x32xf32> to vector<1x32xf32>
    %cst_51 = arith.constant dense<0.000000e+00> : vector<8xf32>
    %121 = vector.multi_reduction <add>, %116, %cst_51 [1] : vector<8x32xf32> to vector<8xf32>
    %122 = vector.shape_cast %121 : vector<8xf32> to vector<8x1xf32>
    %cst_52 = arith.constant 3.200000e+01 : f32
    %123 = vector.broadcast %cst_52 : f32 to vector<8x1xf32>
    %124 = arith.divf %122, %123 : vector<8x1xf32>
    %125 = vector.broadcast %124 : vector<8x1xf32> to vector<8x32xf32>
    %126 = arith.subf %116, %125 : vector<8x32xf32>
    %127 = arith.mulf %126, %126 : vector<8x32xf32>
    %cst_53 = arith.constant dense<0.000000e+00> : vector<8xf32>
    %128 = vector.multi_reduction <add>, %127, %cst_53 [1] : vector<8x32xf32> to vector<8xf32>
    %129 = vector.shape_cast %128 : vector<8xf32> to vector<8x1xf32>
    %cst_54 = arith.constant 3.200000e+01 : f32
    %130 = vector.broadcast %cst_54 : f32 to vector<8x1xf32>
    %131 = arith.divf %129, %130 : vector<8x1xf32>
    %cst_55 = arith.constant 9.99999996E-13 : f32
    %132 = vector.broadcast %cst_55 : f32 to vector<8x1xf32>
    %133 = arith.addf %131, %132 : vector<8x1xf32>
    %134 = math.rsqrt %133 : vector<8x1xf32>
    %135 = vector.broadcast %134 : vector<8x1xf32> to vector<8x32xf32>
    %136 = arith.mulf %126, %135 : vector<8x32xf32>
    %137 = vector.broadcast %118 : vector<1x32xf32> to vector<8x32xf32>
    %138 = arith.mulf %136, %137 : vector<8x32xf32>
    %139 = vector.broadcast %120 : vector<1x32xf32> to vector<8x32xf32>
    %140 = arith.addf %138, %139 : vector<8x32xf32>
    %141 = arith.truncf %140 : vector<8x32xf32> to vector<8x32xbf16>
    %cst_56 = arith.constant dense<0.000000e+00> : vector<8x64xf32>
    %142 = tpu.matmul %141, %48, %cst_56 {dimension_numbers = #tpu.dot_dimension_numbers<[1], [0], [0], [1], [0, 0, 1, 1], [], []>} : vector<8x32xbf16>, vector<32x64xbf16>, vector<8x64xf32> -> vector<8x64xf32>
    %c0_57 = arith.constant 0 : index
    %c4 = arith.constant 4 : index
    %c0_58 = arith.constant 0 : index
    %143 = vector.load %arg6[%c0_57, %c4, %c0_58] : memref<2x8x96xf32, #tpu.memory_space<vmem>>, vector<1x1x64xf32>
    %144 = vector.shape_cast %143 : vector<1x1x64xf32> to vector<1x64xf32>
    %145 = vector.broadcast %144 : vector<1x64xf32> to vector<8x64xf32>
    %146 = arith.addf %142, %145 : vector<8x64xf32>
    %cst_59 = arith.constant 5.000000e-01 : f32
    %147 = vector.broadcast %cst_59 : f32 to vector<8x64xf32>
    %148 = arith.mulf %147, %146 : vector<8x64xf32>
    %cst_60 = arith.constant 4.471500e-02 : f32
    %149 = vector.broadcast %cst_60 : f32 to vector<8x64xf32>
    %150 = arith.mulf %149, %146 : vector<8x64xf32>
    %151 = arith.mulf %150, %146 : vector<8x64xf32>
    %152 = arith.mulf %151, %146 : vector<8x64xf32>
    %153 = arith.addf %146, %152 : vector<8x64xf32>
    %cst_61 = arith.constant 0.797884583 : f32
    %154 = vector.broadcast %cst_61 : f32 to vector<8x64xf32>
    %155 = arith.mulf %154, %153 : vector<8x64xf32>
    %156 = math.tanh %155 : vector<8x64xf32>
    %cst_62 = arith.constant 1.000000e+00 : f32
    %157 = vector.broadcast %cst_62 : f32 to vector<8x64xf32>
    %158 = arith.addf %157, %156 : vector<8x64xf32>
    %159 = arith.mulf %148, %158 : vector<8x64xf32>
    %160 = arith.truncf %159 : vector<8x64xf32> to vector<8x64xbf16>
    %cst_63 = arith.constant dense<0.000000e+00> : vector<8x32xf32>
    %161 = tpu.matmul %160, %50, %cst_63 {dimension_numbers = #tpu.dot_dimension_numbers<[1], [0], [0], [1], [0, 0, 1, 1], [], []>} : vector<8x64xbf16>, vector<64x32xbf16>, vector<8x32xf32> -> vector<8x32xf32>
    %c0_64 = arith.constant 0 : index
    %c5 = arith.constant 5 : index
    %c0_65 = arith.constant 0 : index
    %162 = vector.load %arg6[%c0_64, %c5, %c0_65] : memref<2x8x96xf32, #tpu.memory_space<vmem>>, vector<1x1x32xf32>
    %163 = vector.shape_cast %162 : vector<1x1x32xf32> to vector<1x32xf32>
    %164 = vector.broadcast %163 : vector<1x32xf32> to vector<8x32xf32>
    %165 = arith.addf %161, %164 : vector<8x32xf32>
    %166 = arith.addf %140, %165 : vector<8x32xf32>
    %c0_66 = arith.constant 0 : index
    %c6 = arith.constant 6 : index
    %c0_67 = arith.constant 0 : index
    %167 = vector.load %arg6[%c0_66, %c6, %c0_67] : memref<2x8x96xf32, #tpu.memory_space<vmem>>, vector<1x1x32xf32>
    %168 = vector.shape_cast %167 : vector<1x1x32xf32> to vector<1x32xf32>
    %c0_68 = arith.constant 0 : index
    %c7 = arith.constant 7 : index
    %c0_69 = arith.constant 0 : index
    %169 = vector.load %arg6[%c0_68, %c7, %c0_69] : memref<2x8x96xf32, #tpu.memory_space<vmem>>, vector<1x1x32xf32>
    %170 = vector.shape_cast %169 : vector<1x1x32xf32> to vector<1x32xf32>
    %cst_70 = arith.constant dense<0.000000e+00> : vector<8xf32>
    %171 = vector.multi_reduction <add>, %166, %cst_70 [1] : vector<8x32xf32> to vector<8xf32>
    %172 = vector.shape_cast %171 : vector<8xf32> to vector<8x1xf32>
    %cst_71 = arith.constant 3.200000e+01 : f32
    %173 = vector.broadcast %cst_71 : f32 to vector<8x1xf32>
    %174 = arith.divf %172, %173 : vector<8x1xf32>
    %175 = vector.broadcast %174 : vector<8x1xf32> to vector<8x32xf32>
    %176 = arith.subf %166, %175 : vector<8x32xf32>
    %177 = arith.mulf %176, %176 : vector<8x32xf32>
    %cst_72 = arith.constant dense<0.000000e+00> : vector<8xf32>
    %178 = vector.multi_reduction <add>, %177, %cst_72 [1] : vector<8x32xf32> to vector<8xf32>
    %179 = vector.shape_cast %178 : vector<8xf32> to vector<8x1xf32>
    %cst_73 = arith.constant 3.200000e+01 : f32
    %180 = vector.broadcast %cst_73 : f32 to vector<8x1xf32>
    %181 = arith.divf %179, %180 : vector<8x1xf32>
    %cst_74 = arith.constant 9.99999996E-13 : f32
    %182 = vector.broadcast %cst_74 : f32 to vector<8x1xf32>
    %183 = arith.addf %181, %182 : vector<8x1xf32>
    %184 = math.rsqrt %183 : vector<8x1xf32>
    %185 = vector.broadcast %184 : vector<8x1xf32> to vector<8x32xf32>
    %186 = arith.mulf %176, %185 : vector<8x32xf32>
    %187 = vector.broadcast %168 : vector<1x32xf32> to vector<8x32xf32>
    %188 = arith.mulf %186, %187 : vector<8x32xf32>
    %189 = vector.broadcast %170 : vector<1x32xf32> to vector<8x32xf32>
    %190 = arith.addf %188, %189 : vector<8x32xf32>
    %c1_75 = arith.constant 1 : index
    %c0_76 = arith.constant 0 : index
    %c0_77 = arith.constant 0 : index
    %191 = vector.load %arg4[%c1_75, %c0_76, %c0_77] : memref<2x32x192xbf16, #tpu.memory_space<vmem>>, vector<1x32x96xbf16>
    %192 = vector.shape_cast %191 : vector<1x32x96xbf16> to vector<32x96xbf16>
    %c1_78 = arith.constant 1 : index
    %c0_79 = arith.constant 0 : index
    %c96_80 = arith.constant 96 : index
    %193 = vector.load %arg4[%c1_78, %c0_79, %c96_80] : memref<2x32x192xbf16, #tpu.memory_space<vmem>>, vector<1x32x32xbf16>
    %194 = vector.shape_cast %193 : vector<1x32x32xbf16> to vector<32x32xbf16>
    %c1_81 = arith.constant 1 : index
    %c0_82 = arith.constant 0 : index
    %c128_83 = arith.constant 128 : index
    %195 = vector.load %arg4[%c1_81, %c0_82, %c128_83] : memref<2x32x192xbf16, #tpu.memory_space<vmem>>, vector<1x32x64xbf16>
    %196 = vector.shape_cast %195 : vector<1x32x64xbf16> to vector<32x64xbf16>
    %c1_84 = arith.constant 1 : index
    %c0_85 = arith.constant 0 : index
    %c0_86 = arith.constant 0 : index
    %197 = vector.load %arg5[%c1_84, %c0_85, %c0_86] : memref<2x64x32xbf16, #tpu.memory_space<vmem>>, vector<1x64x32xbf16>
    %198 = vector.shape_cast %197 : vector<1x64x32xbf16> to vector<64x32xbf16>
    %199 = arith.truncf %190 : vector<8x32xf32> to vector<8x32xbf16>
    %cst_87 = arith.constant dense<0.000000e+00> : vector<8x96xf32>
    %200 = tpu.matmul %199, %192, %cst_87 {dimension_numbers = #tpu.dot_dimension_numbers<[1], [0], [0], [1], [0, 0, 1, 1], [], []>} : vector<8x32xbf16>, vector<32x96xbf16>, vector<8x96xf32> -> vector<8x96xf32>
    %c1_88 = arith.constant 1 : index
    %c0_89 = arith.constant 0 : index
    %c0_90 = arith.constant 0 : index
    %201 = vector.load %arg6[%c1_88, %c0_89, %c0_90] : memref<2x8x96xf32, #tpu.memory_space<vmem>>, vector<1x1x96xf32>
    %202 = vector.shape_cast %201 : vector<1x1x96xf32> to vector<1x96xf32>
    %203 = vector.broadcast %202 : vector<1x96xf32> to vector<8x96xf32>
    %204 = arith.addf %200, %203 : vector<8x96xf32>
    %cst_91 = arith.constant 0.000000e+00 : f32
    %205 = vector.broadcast %cst_91 : f32 to vector<8x32xf32>
    %206 = vector.extract_strided_slice %204 {offsets = [0, 0], sizes = [8, 16], strides = [1, 1]} : vector<8x96xf32> to vector<8x16xf32>
    %207 = vector.extract_strided_slice %204 {offsets = [0, 32], sizes = [8, 16], strides = [1, 1]} : vector<8x96xf32> to vector<8x16xf32>
    %208 = vector.extract_strided_slice %204 {offsets = [0, 64], sizes = [8, 16], strides = [1, 1]} : vector<8x96xf32> to vector<8x16xf32>
    %209 = arith.truncf %206 : vector<8x16xf32> to vector<8x16xbf16>
    %210 = arith.truncf %207 : vector<8x16xf32> to vector<8x16xbf16>
    "tpu.trace_start"() <{level = 10 : i32, message = "qd,kd->qk"}> : () -> ()
    %cst_92 = arith.constant dense<0.000000e+00> : vector<8x8xf32>
    %211 = tpu.matmul %209, %210, %cst_92 {dimension_numbers = #tpu.dot_dimension_numbers<[1], [1], [0], [0], [0, 0, 1, 0], [], []>} : vector<8x16xbf16>, vector<8x16xbf16>, vector<8x8xf32> -> vector<8x8xf32>
    "tpu.trace_stop"() : () -> ()
    %cst_93 = arith.constant 2.500000e-01 : f32
    %212 = vector.broadcast %cst_93 : f32 to vector<8x8xf32>
    %213 = arith.mulf %211, %212 : vector<8x8xf32>
    %214 = vector.broadcast %42 : vector<1x8xf32> to vector<8x8xf32>
    %215 = arith.addf %213, %214 : vector<8x8xf32>
    %cst_94 = arith.constant dense<0xFF800000> : vector<8xf32>
    %216 = vector.multi_reduction <maximumf>, %215, %cst_94 [1] : vector<8x8xf32> to vector<8xf32>
    %217 = vector.shape_cast %216 : vector<8xf32> to vector<8x1xf32>
    %218 = vector.broadcast %217 : vector<8x1xf32> to vector<8x8xf32>
    %219 = arith.subf %215, %218 : vector<8x8xf32>
    %220 = math.exp %219 : vector<8x8xf32>
    %cst_95 = arith.constant dense<0.000000e+00> : vector<8xf32>
    %221 = vector.multi_reduction <add>, %220, %cst_95 [1] : vector<8x8xf32> to vector<8xf32>
    %222 = vector.shape_cast %221 : vector<8xf32> to vector<8x1xf32>
    %223 = tpu.reciprocal %222 {approx = true} : vector<8x1xf32> -> vector<8x1xf32>
    %224 = vector.broadcast %223 : vector<8x1xf32> to vector<8x8xf32>
    %225 = arith.mulf %220, %224 : vector<8x8xf32>
    %226 = arith.truncf %225 : vector<8x8xf32> to vector<8x8xbf16>
    %227 = arith.truncf %208 : vector<8x16xf32> to vector<8x16xbf16>
    %cst_96 = arith.constant dense<0.000000e+00> : vector<8x16xf32>
    %228 = tpu.matmul %226, %227, %cst_96 {dimension_numbers = #tpu.dot_dimension_numbers<[1], [0], [0], [1], [0, 0, 1, 1], [], []>} : vector<8x8xbf16>, vector<8x16xbf16>, vector<8x16xf32> -> vector<8x16xf32>
    %229 = vector.extract_strided_slice %194 {offsets = [0, 0], sizes = [16, 32], strides = [1, 1]} : vector<32x32xbf16> to vector<16x32xbf16>
    %230 = arith.truncf %228 : vector<8x16xf32> to vector<8x16xbf16>
    %cst_97 = arith.constant dense<0.000000e+00> : vector<8x32xf32>
    %231 = tpu.matmul %230, %229, %cst_97 {dimension_numbers = #tpu.dot_dimension_numbers<[1], [0], [0], [1], [0, 0, 1, 1], [], []>} : vector<8x16xbf16>, vector<16x32xbf16>, vector<8x32xf32> -> vector<8x32xf32>
    %232 = arith.addf %205, %231 : vector<8x32xf32>
    %233 = vector.extract_strided_slice %204 {offsets = [0, 16], sizes = [8, 16], strides = [1, 1]} : vector<8x96xf32> to vector<8x16xf32>
    %234 = vector.extract_strided_slice %204 {offsets = [0, 48], sizes = [8, 16], strides = [1, 1]} : vector<8x96xf32> to vector<8x16xf32>
    %235 = vector.extract_strided_slice %204 {offsets = [0, 80], sizes = [8, 16], strides = [1, 1]} : vector<8x96xf32> to vector<8x16xf32>
    %236 = arith.truncf %233 : vector<8x16xf32> to vector<8x16xbf16>
    %237 = arith.truncf %234 : vector<8x16xf32> to vector<8x16xbf16>
    "tpu.trace_start"() <{level = 10 : i32, message = "qd,kd->qk"}> : () -> ()
    %cst_98 = arith.constant dense<0.000000e+00> : vector<8x8xf32>
    %238 = tpu.matmul %236, %237, %cst_98 {dimension_numbers = #tpu.dot_dimension_numbers<[1], [1], [0], [0], [0, 0, 1, 0], [], []>} : vector<8x16xbf16>, vector<8x16xbf16>, vector<8x8xf32> -> vector<8x8xf32>
    "tpu.trace_stop"() : () -> ()
    %cst_99 = arith.constant 2.500000e-01 : f32
    %239 = vector.broadcast %cst_99 : f32 to vector<8x8xf32>
    %240 = arith.mulf %238, %239 : vector<8x8xf32>
    %241 = vector.broadcast %42 : vector<1x8xf32> to vector<8x8xf32>
    %242 = arith.addf %240, %241 : vector<8x8xf32>
    %cst_100 = arith.constant dense<0xFF800000> : vector<8xf32>
    %243 = vector.multi_reduction <maximumf>, %242, %cst_100 [1] : vector<8x8xf32> to vector<8xf32>
    %244 = vector.shape_cast %243 : vector<8xf32> to vector<8x1xf32>
    %245 = vector.broadcast %244 : vector<8x1xf32> to vector<8x8xf32>
    %246 = arith.subf %242, %245 : vector<8x8xf32>
    %247 = math.exp %246 : vector<8x8xf32>
    %cst_101 = arith.constant dense<0.000000e+00> : vector<8xf32>
    %248 = vector.multi_reduction <add>, %247, %cst_101 [1] : vector<8x8xf32> to vector<8xf32>
    %249 = vector.shape_cast %248 : vector<8xf32> to vector<8x1xf32>
    %250 = tpu.reciprocal %249 {approx = true} : vector<8x1xf32> -> vector<8x1xf32>
    %251 = vector.broadcast %250 : vector<8x1xf32> to vector<8x8xf32>
    %252 = arith.mulf %247, %251 : vector<8x8xf32>
    %253 = arith.truncf %252 : vector<8x8xf32> to vector<8x8xbf16>
    %254 = arith.truncf %235 : vector<8x16xf32> to vector<8x16xbf16>
    %cst_102 = arith.constant dense<0.000000e+00> : vector<8x16xf32>
    %255 = tpu.matmul %253, %254, %cst_102 {dimension_numbers = #tpu.dot_dimension_numbers<[1], [0], [0], [1], [0, 0, 1, 1], [], []>} : vector<8x8xbf16>, vector<8x16xbf16>, vector<8x16xf32> -> vector<8x16xf32>
    %256 = vector.extract_strided_slice %194 {offsets = [16, 0], sizes = [16, 32], strides = [1, 1]} : vector<32x32xbf16> to vector<16x32xbf16>
    %257 = arith.truncf %255 : vector<8x16xf32> to vector<8x16xbf16>
    %cst_103 = arith.constant dense<0.000000e+00> : vector<8x32xf32>
    %258 = tpu.matmul %257, %256, %cst_103 {dimension_numbers = #tpu.dot_dimension_numbers<[1], [0], [0], [1], [0, 0, 1, 1], [], []>} : vector<8x16xbf16>, vector<16x32xbf16>, vector<8x32xf32> -> vector<8x32xf32>
    %259 = arith.addf %232, %258 : vector<8x32xf32>
    %c1_104 = arith.constant 1 : index
    %c1_105 = arith.constant 1 : index
    %c0_106 = arith.constant 0 : index
    %260 = vector.load %arg6[%c1_104, %c1_105, %c0_106] : memref<2x8x96xf32, #tpu.memory_space<vmem>>, vector<1x1x32xf32>
    %261 = vector.shape_cast %260 : vector<1x1x32xf32> to vector<1x32xf32>
    %262 = vector.broadcast %261 : vector<1x32xf32> to vector<8x32xf32>
    %263 = arith.addf %259, %262 : vector<8x32xf32>
    %264 = arith.addf %190, %263 : vector<8x32xf32>
    %c1_107 = arith.constant 1 : index
    %c2_108 = arith.constant 2 : index
    %c0_109 = arith.constant 0 : index
    %265 = vector.load %arg6[%c1_107, %c2_108, %c0_109] : memref<2x8x96xf32, #tpu.memory_space<vmem>>, vector<1x1x32xf32>
    %266 = vector.shape_cast %265 : vector<1x1x32xf32> to vector<1x32xf32>
    %c1_110 = arith.constant 1 : index
    %c3_111 = arith.constant 3 : index
    %c0_112 = arith.constant 0 : index
    %267 = vector.load %arg6[%c1_110, %c3_111, %c0_112] : memref<2x8x96xf32, #tpu.memory_space<vmem>>, vector<1x1x32xf32>
    %268 = vector.shape_cast %267 : vector<1x1x32xf32> to vector<1x32xf32>
    %cst_113 = arith.constant dense<0.000000e+00> : vector<8xf32>
    %269 = vector.multi_reduction <add>, %264, %cst_113 [1] : vector<8x32xf32> to vector<8xf32>
    %270 = vector.shape_cast %269 : vector<8xf32> to vector<8x1xf32>
    %cst_114 = arith.constant 3.200000e+01 : f32
    %271 = vector.broadcast %cst_114 : f32 to vector<8x1xf32>
    %272 = arith.divf %270, %271 : vector<8x1xf32>
    %273 = vector.broadcast %272 : vector<8x1xf32> to vector<8x32xf32>
    %274 = arith.subf %264, %273 : vector<8x32xf32>
    %275 = arith.mulf %274, %274 : vector<8x32xf32>
    %cst_115 = arith.constant dense<0.000000e+00> : vector<8xf32>
    %276 = vector.multi_reduction <add>, %275, %cst_115 [1] : vector<8x32xf32> to vector<8xf32>
    %277 = vector.shape_cast %276 : vector<8xf32> to vector<8x1xf32>
    %cst_116 = arith.constant 3.200000e+01 : f32
    %278 = vector.broadcast %cst_116 : f32 to vector<8x1xf32>
    %279 = arith.divf %277, %278 : vector<8x1xf32>
    %cst_117 = arith.constant 9.99999996E-13 : f32
    %280 = vector.broadcast %cst_117 : f32 to vector<8x1xf32>
    %281 = arith.addf %279, %280 : vector<8x1xf32>
    %282 = math.rsqrt %281 : vector<8x1xf32>
    %283 = vector.broadcast %282 : vector<8x1xf32> to vector<8x32xf32>
    %284 = arith.mulf %274, %283 : vector<8x32xf32>
    %285 = vector.broadcast %266 : vector<1x32xf32> to vector<8x32xf32>
    %286 = arith.mulf %284, %285 : vector<8x32xf32>
    %287 = vector.broadcast %268 : vector<1x32xf32> to vector<8x32xf32>
    %288 = arith.addf %286, %287 : vector<8x32xf32>
    %289 = arith.truncf %288 : vector<8x32xf32> to vector<8x32xbf16>
    %cst_118 = arith.constant dense<0.000000e+00> : vector<8x64xf32>
    %290 = tpu.matmul %289, %196, %cst_118 {dimension_numbers = #tpu.dot_dimension_numbers<[1], [0], [0], [1], [0, 0, 1, 1], [], []>} : vector<8x32xbf16>, vector<32x64xbf16>, vector<8x64xf32> -> vector<8x64xf32>
    %c1_119 = arith.constant 1 : index
    %c4_120 = arith.constant 4 : index
    %c0_121 = arith.constant 0 : index
    %291 = vector.load %arg6[%c1_119, %c4_120, %c0_121] : memref<2x8x96xf32, #tpu.memory_space<vmem>>, vector<1x1x64xf32>
    %292 = vector.shape_cast %291 : vector<1x1x64xf32> to vector<1x64xf32>
    %293 = vector.broadcast %292 : vector<1x64xf32> to vector<8x64xf32>
    %294 = arith.addf %290, %293 : vector<8x64xf32>
    %cst_122 = arith.constant 5.000000e-01 : f32
    %295 = vector.broadcast %cst_122 : f32 to vector<8x64xf32>
    %296 = arith.mulf %295, %294 : vector<8x64xf32>
    %cst_123 = arith.constant 4.471500e-02 : f32
    %297 = vector.broadcast %cst_123 : f32 to vector<8x64xf32>
    %298 = arith.mulf %297, %294 : vector<8x64xf32>
    %299 = arith.mulf %298, %294 : vector<8x64xf32>
    %300 = arith.mulf %299, %294 : vector<8x64xf32>
    %301 = arith.addf %294, %300 : vector<8x64xf32>
    %cst_124 = arith.constant 0.797884583 : f32
    %302 = vector.broadcast %cst_124 : f32 to vector<8x64xf32>
    %303 = arith.mulf %302, %301 : vector<8x64xf32>
    %304 = math.tanh %303 : vector<8x64xf32>
    %cst_125 = arith.constant 1.000000e+00 : f32
    %305 = vector.broadcast %cst_125 : f32 to vector<8x64xf32>
    %306 = arith.addf %305, %304 : vector<8x64xf32>
    %307 = arith.mulf %296, %306 : vector<8x64xf32>
    %308 = arith.truncf %307 : vector<8x64xf32> to vector<8x64xbf16>
    %cst_126 = arith.constant dense<0.000000e+00> : vector<8x32xf32>
    %309 = tpu.matmul %308, %198, %cst_126 {dimension_numbers = #tpu.dot_dimension_numbers<[1], [0], [0], [1], [0, 0, 1, 1], [], []>} : vector<8x64xbf16>, vector<64x32xbf16>, vector<8x32xf32> -> vector<8x32xf32>
    %c1_127 = arith.constant 1 : index
    %c5_128 = arith.constant 5 : index
    %c0_129 = arith.constant 0 : index
    %310 = vector.load %arg6[%c1_127, %c5_128, %c0_129] : memref<2x8x96xf32, #tpu.memory_space<vmem>>, vector<1x1x32xf32>
    %311 = vector.shape_cast %310 : vector<1x1x32xf32> to vector<1x32xf32>
    %312 = vector.broadcast %311 : vector<1x32xf32> to vector<8x32xf32>
    %313 = arith.addf %309, %312 : vector<8x32xf32>
    %314 = arith.addf %288, %313 : vector<8x32xf32>
    %c1_130 = arith.constant 1 : index
    %c6_131 = arith.constant 6 : index
    %c0_132 = arith.constant 0 : index
    %315 = vector.load %arg6[%c1_130, %c6_131, %c0_132] : memref<2x8x96xf32, #tpu.memory_space<vmem>>, vector<1x1x32xf32>
    %316 = vector.shape_cast %315 : vector<1x1x32xf32> to vector<1x32xf32>
    %c1_133 = arith.constant 1 : index
    %c7_134 = arith.constant 7 : index
    %c0_135 = arith.constant 0 : index
    %317 = vector.load %arg6[%c1_133, %c7_134, %c0_135] : memref<2x8x96xf32, #tpu.memory_space<vmem>>, vector<1x1x32xf32>
    %318 = vector.shape_cast %317 : vector<1x1x32xf32> to vector<1x32xf32>
    %cst_136 = arith.constant dense<0.000000e+00> : vector<8xf32>
    %319 = vector.multi_reduction <add>, %314, %cst_136 [1] : vector<8x32xf32> to vector<8xf32>
    %320 = vector.shape_cast %319 : vector<8xf32> to vector<8x1xf32>
    %cst_137 = arith.constant 3.200000e+01 : f32
    %321 = vector.broadcast %cst_137 : f32 to vector<8x1xf32>
    %322 = arith.divf %320, %321 : vector<8x1xf32>
    %323 = vector.broadcast %322 : vector<8x1xf32> to vector<8x32xf32>
    %324 = arith.subf %314, %323 : vector<8x32xf32>
    %325 = arith.mulf %324, %324 : vector<8x32xf32>
    %cst_138 = arith.constant dense<0.000000e+00> : vector<8xf32>
    %326 = vector.multi_reduction <add>, %325, %cst_138 [1] : vector<8x32xf32> to vector<8xf32>
    %327 = vector.shape_cast %326 : vector<8xf32> to vector<8x1xf32>
    %cst_139 = arith.constant 3.200000e+01 : f32
    %328 = vector.broadcast %cst_139 : f32 to vector<8x1xf32>
    %329 = arith.divf %327, %328 : vector<8x1xf32>
    %cst_140 = arith.constant 9.99999996E-13 : f32
    %330 = vector.broadcast %cst_140 : f32 to vector<8x1xf32>
    %331 = arith.addf %329, %330 : vector<8x1xf32>
    %332 = math.rsqrt %331 : vector<8x1xf32>
    %333 = vector.broadcast %332 : vector<8x1xf32> to vector<8x32xf32>
    %334 = arith.mulf %324, %333 : vector<8x32xf32>
    %335 = vector.broadcast %316 : vector<1x32xf32> to vector<8x32xf32>
    %336 = arith.mulf %334, %335 : vector<8x32xf32>
    %337 = vector.broadcast %318 : vector<1x32xf32> to vector<8x32xf32>
    %338 = arith.addf %336, %337 : vector<8x32xf32>
    %cst_141 = arith.constant dense<0.000000e+00> : vector<32xf32>
    %339 = vector.multi_reduction <add>, %338, %cst_141 [0] : vector<8x32xf32> to vector<32xf32>
    %340 = vector.shape_cast %339 : vector<32xf32> to vector<1x32xf32>
    %cst_142 = arith.constant 8.000000e+00 : f32
    %341 = vector.broadcast %cst_142 : f32 to vector<1x32xf32>
    %342 = arith.divf %340, %341 : vector<1x32xf32>
    %c0_143 = arith.constant 0 : index
    %c0_144 = arith.constant 0 : index
    %343 = vector.load %arg7[%c0_143, %c0_144] : memref<32x128xbf16, #tpu.memory_space<vmem>>, vector<32x128xbf16>
    %344 = arith.truncf %342 : vector<1x32xf32> to vector<1x32xbf16>
    %cst_145 = arith.constant dense<0.000000e+00> : vector<1x128xf32>
    %345 = tpu.matmul %344, %343, %cst_145 {dimension_numbers = #tpu.dot_dimension_numbers<[1], [0], [0], [1], [0, 0, 1, 1], [], []>} : vector<1x32xbf16>, vector<32x128xbf16>, vector<1x128xf32> -> vector<1x128xf32>
    %c0_146 = arith.constant 0 : index
    %c0_147 = arith.constant 0 : index
    %346 = vector.load %arg8[%c0_146, %c0_147] : memref<1x128xf32, #tpu.memory_space<vmem>>, vector<1x128xf32>
    %347 = arith.addf %345, %346 : vector<1x128xf32>
    %cst_148 = arith.constant 0.000000e+00 : f32
    %348 = vector.broadcast %cst_148 : f32 to vector<1x128xf32>
    %349 = arith.subf %348, %347 : vector<1x128xf32>
    %350 = math.exp %349 : vector<1x128xf32>
    %cst_149 = arith.constant 1.000000e+00 : f32
    %351 = vector.broadcast %cst_149 : f32 to vector<1x128xf32>
    %352 = arith.addf %351, %350 : vector<1x128xf32>
    %cst_150 = arith.constant 1.000000e+00 : f32
    %353 = vector.broadcast %cst_150 : f32 to vector<1x128xf32>
    %354 = arith.divf %353, %352 : vector<1x128xf32>
    %c0_151 = arith.constant 0 : index
    %c0_152 = arith.constant 0 : index
    %c0_153 = arith.constant 0 : index
    %355 = vector.load %arg9[%c0_151, %c0_152, %c0_153] : memref<1x1x128xf32, #tpu.memory_space<vmem>>, vector<1x1x128xf32>
    %356 = vector.shape_cast %355 : vector<1x1x128xf32> to vector<1x128xf32>
    %357 = vector.shape_cast %354 : vector<1x128xf32> to vector<1x1x128xf32>
    tpu.vector_store %arg9[%c0_151, %c0_152, %c0_153], %357 {strides = array<i32>} : memref<1x1x128xf32, #tpu.memory_space<vmem>>, vector<1x1x128xf32>,
    return
  }
  func.func @transform_0(%arg0: i32) -> (i32, i32, i32) {
    %c0_i32 = arith.constant 0 : i32
    %c0_i32_0 = arith.constant 0 : i32
    %c0_i32_1 = arith.constant 0 : i32
    return %arg0, %c0_i32, %c0_i32_0 : i32, i32, i32
  }
  func.func @transform_1(%arg0: i32) -> (i32, i32, i32) {
    %c0_i32 = arith.constant 0 : i32
    %c0_i32_0 = arith.constant 0 : i32
    %c0_i32_1 = arith.constant 0 : i32
    return %arg0, %c0_i32, %c0_i32_0 : i32, i32, i32
  }
  func.func @transform_2(%arg0: i32) -> (i32, i32) {
    %c0_i32 = arith.constant 0 : i32
    %c0_i32_0 = arith.constant 0 : i32
    %c0_i32_1 = arith.constant 0 : i32
    return %c0_i32, %c0_i32_0 : i32, i32
  }
  func.func @transform_3(%arg0: i32) -> (i32, i32, i32) {
    %c0_i32 = arith.constant 0 : i32
    %c0_i32_0 = arith.constant 0 : i32
    %c0_i32_1 = arith.constant 0 : i32
    %c0_i32_2 = arith.constant 0 : i32
    return %c0_i32, %c0_i32_0, %c0_i32_1 : i32, i32, i32
  }
  func.func @transform_4(%arg0: i32) -> (i32, i32, i32) {
    %c0_i32 = arith.constant 0 : i32
    %c0_i32_0 = arith.constant 0 : i32
    %c0_i32_1 = arith.constant 0 : i32
    %c0_i32_2 = arith.constant 0 : i32
    return %c0_i32, %c0_i32_0, %c0_i32_1 : i32, i32, i32
  }
  func.func @transform_5(%arg0: i32) -> (i32, i32, i32) {
    %c0_i32 = arith.constant 0 : i32
    %c0_i32_0 = arith.constant 0 : i32
    %c0_i32_1 = arith.constant 0 : i32
    %c0_i32_2 = arith.constant 0 : i32
    return %c0_i32, %c0_i32_0, %c0_i32_1 : i32, i32, i32
  }
  func.func @transform_6(%arg0: i32) -> (i32, i32) {
    %c0_i32 = arith.constant 0 : i32
    %c0_i32_0 = arith.constant 0 : i32
    %c0_i32_1 = arith.constant 0 : i32
    return %c0_i32, %c0_i32_0 : i32, i32
  }
  func.func @transform_7(%arg0: i32) -> (i32, i32) {
    %c0_i32 = arith.constant 0 : i32
    %c0_i32_0 = arith.constant 0 : i32
    %c0_i32_1 = arith.constant 0 : i32
    return %c0_i32, %c0_i32_0 : i32, i32
  }
  func.func @transform_8(%arg0: i32) -> (i32, i32, i32) {
    %c0_i32 = arith.constant 0 : i32
    %c0_i32_0 = arith.constant 0 : i32
    %c0_i32_1 = arith.constant 0 : i32
    return %arg0, %c0_i32, %c0_i32_0 : i32, i32, i32
  }
}

</mosaic_0001>

<bundles_post_ra>
// kernel: my_bert_model.1
= control target key start
LH: loop header
LB: loop body
LE: loop exit
PB: predicated region body
PF: predicated region fallthrough
CT: control target
= control target key end

     0   :  { %13 = vsyncpa [#allocation3], 0  ;;  %s2777_s0 = inlined_call_operand.vmem [shape: s32[2,8,1], index: 0, kind: input, shape index: {}]   ;;  %s2778_s1 = inlined_call_operand.vmem [shape: s32[2,1,8], index: 1, kind: input, shape index: {}]   ;;  %s2779_s2 = inlined_call_operand.vmem [shape: f32[135,32], index: 2, kind: input, shape index: {}]   ;;  %s2780_s3 = inlined_call_operand.vmem [shape: bf16[2,32,192], index: 3, kind: input, shape index: {}]   ;;  %s2781_s4 = inlined_call_operand.vmem [shape: bf16[2,64,32], index: 4, kind: input, shape index: {}]   ;;  %s2782_s5 = inlined_call_operand.vmem [shape: f32[2,8,96], index: 5, kind: input, shape index: {}]   ;;  %s2783_s6 = inlined_call_operand.vmem [shape: bf16[32,128], index: 6, kind: input, shape index: {}]   ;;  %s2784_s7 = inlined_call_operand.vmem [shape: f32[1,128], index: 7, kind: input, shape index: {}]   ;;  %s2785_s8 = inlined_call_operand.hbm [shape: f32[2,1,128], index: 8, kind: output, shape index: {}]  }
   0x1   :  { %15 = vsyncpa [#allocation3 + $0x1], 0  ;;  %s2348_s27 = smov 0   ;;  %s2350_s28 = smov 0  }
   0x2   :  { %s2352_s29 = smov 0   ;;  %s2354_s30 = smov 0  }
   0x3 LB: > { %s2369_s9 = sadd.s32 4294967295, %s2291_s30   ;;  %s1811_s10 = sadd.s32 4294967294, %s2291_s30   ;;  %s2291_s30 = sphi %s2354_s30, %s2793_s30   ;;  %s2287_s29 = sphi %s2352_s29, %s2792_s29   ;;  %s2283_s28 = sphi %s2350_s28, %s2791_s28   ;;  %s2279_s27 = sphi %s2348_s27, %s2790_s27  }
   0x4   : > { %s2373_s11 = sadd.s32 1, %s2291_s30   ;;  %s206_s12 = sadd.s32 1, %s2287_s29 }
   0x5   : > { %s203_s13 = ssub.s32 %s2291_s30, %s2373_s11  ;;  %p216_p0 = scmp.ne.s32.totalorder %s2287_s29, %s2283_s28 }
   0x6   : > { %p204_p1 = scmp.eq.s32.totalorder %s203_s13, 0  ;;  %p217_p2 = scmp.eq.s32.totalorder %s2369_s9, 1 }
   0x7   : > { %p222_p3 = scmp.ne.s32.totalorder %s2283_s28, %s2279_s27  ;;  %p223_p4 = scmp.eq.s32.totalorder %s1811_s10, 1 }
   0x8   : > { %s2384_s14 = scalar_select %p204_p1, %s2287_s29, %s206_s12  }
   0x9   : > { %p2386_p5 = por %p217_p2, %p216_p0  ;;  %p2390_p6 = por %p223_p4, %p222_p3 }
   0xa   : > { %p1814_p7 = scmp.ge.s32.totalorder %s2291_s30, 1  ;;  %p272_p8 = scmp.lt.s32.totalorder %s2291_s30, 3 }
   0xc   : > { %p273_p9 = pnand %p1814_p7, %p272_p8 }
   0xd   : > { %p307_p10 = scmp.lt.s32.totalorder (!%p273_p9), %s2369_s9, 1  ;;  %s2296_s26 = smov (!%p273_p9), 96  }
   0xe   : > { %276 = sbr.rel (%p273_p9) target bundleno = 5976 (0x1758), region = 52  ;;  %s2298_s12 = smov (!%p273_p9), 64  }
   0xf   : > { %s2299_s13 = smov (!%p273_p9), 112   ;;  %s2786_s17 = smov (!%p273_p9), 48  }
  0x10   : > { %s2301_s18 = smov (!%p273_p9), 32   ;;  %s1899_s23 = sshll.u32 (!%p273_p9), %s2369_s9, 4 }
  0x13   : > { %v336_v0 = vld [vmem:[%s2779_s2 + $0x80] sm:$0xf]  ;;  %vm342_vm0 = vcmask 1043456   ;;  %v2293_v1 = vmov 0   ;;  %v2294_v2 = vmov 0.0   ;;  %v335_v3 = vld [vmem:[%s2779_s2 + $0x78] sm:$0xff]  ;;  %v316_v4 = vlaneseq }
  0x14   : > { %2178 = vset.pattern.permute.xlu0 %v2293_v1  ;;  %1965 = vmatprep.subr.mxu0 %v2294_v2  ;;  %s308_s21 = scalar_select %p307_p10, %s2369_s9, 1  ;;  %v334_v5 = vld [vmem:[%s2779_s2 + $0x70] sm:$0xff]  ;;  %v333_v6 = vld [vmem:[%s2779_s2 + $0x68] sm:$0xff]  ;;  %vm2295_vm1 = vmmov 0   ;;  %v332_v9 = vld [vmem:[%s2779_s2 + $0x60] sm:$0xff]  ;;  %vm338_vm2 = vcmask 818176  }
  0x15   : > { %1966 = vmatpush3.msk.msra.mxu0 %vm342_vm0, %v336_v0  ;;  %1994 = vmatprep.subr.bf16.mxu1 %v2294_v2  ;;  %v584_v7 = vshrl.u32 %v316_v4, 7  ;;  %v331_v12 = vld [vmem:[%s2779_s2 + $0x58] sm:$0xff]  ;;  %v330_v15 = vld [vmem:[%s2779_s2 + $0x50] sm:$0xff]  ;;  %v329_v17 = vld [vmem:[%s2779_s2 + $0x48] sm:$0xff]  ;;  %v317_v24 = vand.u32 127, %v316_v4  ;;  %vm424_vm4 = vcmask 261120  }
  0x16   : > { %1967 = vmatprep.subr.mxu0 %v2294_v2  ;;  %s1815_s24 = sshll.u32 %s308_s21, 3  ;;  %s313_s10 = scalar_lea.vmem %s2778_s1, %s308_s21  ;;  %1991 = vmatprep.mubr.msk.f32.mxu0 %vm2295_vm1, %v2294_v2  ;;  %v328_v19 = vld [vmem:[%s2779_s2 + $0x40] sm:$0xff]  ;;  %v327_v20 = vld [vmem:[%s2779_s2 + $0x38] sm:$0xff]  ;;  %v326_v21 = vld [vmem:[%s2779_s2 + $0x30] sm:$0xff]  ;;  %vm534_vm5 = vcmask 130048   ;;  %vm589_vm6 = vcmask 64512  }
  0x17   : > { %1968 = vmatpush3.msra.mxu0 %v335_v3  ;;  %s310_s19 = scalar_lea.vmem %s2777_s0, %s1815_s24  ;;  %v449_v8 = vld [vmem:[%s313_s10] sm:$0x1]  ;;  %1998 = vmatprep.mubr.msk.bf16.mxu1 %vm2295_vm1, %v2294_v2  ;;  %v585_v14 = vsub.s32 0, %v584_v7  ;;  %v325_v22 = vld [vmem:[%s2779_s2 + $0x28] sm:$0xff]  ;;  %v1819_v29 = vld [vmem:[%s2779_s2 + $0x84] ss:$0 sm:$0xff] }
  0x18   : > { %1969 = vmatprep.subr.mxu0 %v2294_v2  ;;  %v315_v10 = vld [vmem:[%s310_s19] sm:$0xff]  ;;  %v450_v11 = vcvt.s32.f32 %v449_v8  ;;  %v2479_v39 = vld [vmem:[%s2780_s3 + $0x10] ss:$8 sps:$4 sm:$0xff]   ;;  %s2297_s10 = smov 80   ;;  %vm988_vm7 = vcmask 523264   ;;  %s305_s21 = sand.u32 1, %s2283_s28  }
  0x19   : > { %1970 = vmatpush3.msra.mxu0 %v334_v5  ;;  %319 = vperm.xlu0 %2178, %v315_v10   ;;  %v324_v23 = vld [vmem:[%s2779_s2 + $0x20] sm:$0xff] }
  0x1a   : > { %1971 = vmatprep.subr.mxu0 %v2294_v2  ;;  %v451_v13 = vsub.f32 1.0, %v450_v11  ;;  %v337_v27 = vld [vmem:[%s2779_s2] sm:$0xff]  ;;  %1995 = vmatpush3.bf16.msra.mxu1 %v2479_v39 }
  0x1b   : > { %1972 = vmatpush3.msra.mxu0 %v333_v6  ;;  %v2485_v40 = vld [vmem:[%s2780_s3] ss:$8 sps:$4 sm:$0xff]   ;;  %1996 = vmatprep.subr.bf16.mxu1 %v2294_v2  ;;  %v1820_v45 = vld [vmem:[%s2779_s2 + $0x85] ss:$0 sm:$0xff]  ;;  %v1821_v47 = vld [vmem:[%s2779_s2 + $0x86] ss:$0 sm:$0xff] }
  0x1c   : > { %1973 = vmatprep.subr.mxu0 %v2294_v2  ;;  %v452_v16 = vmul.f32 -1e+09, %v451_v13  ;;  %v1822_v51 = vld [vmem:[%s2782_s5] ss:$0 sm:$0xff] }
  0x1d   : > { %1974 = vmatpush3.msra.mxu0 %v332_v9 }
  0x1e   : > { %1975 = vmatprep.subr.mxu0 %v2294_v2  ;;  %v2440_v18 = vrot.slane %v452_v16, %v585_v14  ;;  %1997 = vmatpush3.bf16.msra.mxu1 %v2485_v40 }
  0x1f   : > { %1976 = vmatpush3.msra.mxu0 %v331_v12  ;;  %2002 = vmatprep.subr.bf16.mxu1 %v2294_v2 }
  0x20   : > { %1977 = vmatprep.subr.mxu0 %v2294_v2 }
  0x21   : > { %1978 = vmatpush3.msra.mxu0 %v330_v15 }
  0x22   : > { %1979 = vmatprep.subr.mxu0 %v2294_v2 }
  0x23   : > { %1980 = vmatpush3.msra.mxu0 %v329_v17 }
  0x24   : > { %1981 = vmatprep.subr.mxu0 %v2294_v2 }
  0x25   : > { %1982 = vmatpush3.msra.mxu0 %v328_v19 }
  0x26   : > { %1983 = vmatprep.subr.mxu0 %v2294_v2 }
  0x27   : > { %1984 = vmatpush3.msra.mxu0 %v327_v20 }
  0x28   : > { %1985 = vmatprep.subr.mxu0 %v2294_v2 }
  0x29   : > { %1986 = vmatpush3.msra.mxu0 %v326_v21 }
  0x2a   : > { %1987 = vmatprep.subr.mxu0 %v2294_v2 }
  0x2b   : > { %1988 = vmatpush3.msra.mxu0 %v325_v22 }
  0x2c   : > { %1989 = vmatprep.subr.mxu0 %v2294_v2 }
  0x2d   : > { %1990 = vmatpush3.msra.mxu0 %v324_v23 }
  0x2e   : > { %2020 = vmatprep.subr.bf16.mxu0 %v2294_v2 }
  0x94   : > { %v320_v25 = vpop.permute.xlu0 %319 }
  0x95   : > { %vm321_vm3 = vcmp.eq.s32.totalorder %v320_v25, %v317_v24 }
  0x96   : > { %v1816_v26 = vsel %vm321_vm3, 1.0, %v2294_v2 }
  0x97   : > { %1992 = vmatmul.mubr.msk.f32.vlgmr.msra.gmra.mxu0 %vm338_vm2, %v1816_v26 }
  0x98   : > { %2022 = vmatprep.mubr.msk.bf16.mxu0 %vm2295_vm1, %v2294_v2 }
 0x157   : > { %v412_v28 = vpop.f32.mrf.mxu0 }
 0x158   : > { %v413_v30 = vadd.f32 %v412_v28, %v337_v27 }
 0x159   : > { %v1993_v31 = vpop.f32.mrf.mxu0 }
 0x15a   : > { %v421_v32 = vadd.f32 %v1819_v29, %v413_v30 }
 0x15c   : > { %v425_v33 = vsel %vm424_vm4, %v421_v32, 0.0 }
 0x15d   : > { %426 = vadd.xlane.f32.xlu0 %v425_v33 }
 0x1e6   : > { %v427_v34 = vpop.xlane.xlu0 %426 }
 0x1e7   : > { %v429_v35 = vmul.f32 0.03125, %v427_v34 }
 0x1e9   : > { %v430_v36 = vsub.f32 %v421_v32, %v429_v35 }
 0x1eb   : > { %v431_v37 = vmul.f32 %v430_v36, %v430_v36 }
 0x1ed   : > { %v432_v38 = vsel %vm424_vm4, %v431_v37, 0.0 }
 0x1ee   : > { %433 = vadd.xlane.f32.xlu1 %v432_v38 }
 0x277   : > { %v434_v41 = vpop.xlane.xlu1 %433 }
 0x278   : > { %v435_v42 = vmul.f32 0.03125, %v434_v41 }
 0x27a   : > { %v436_v43 = vadd.f32 1e-12, %v435_v42 }
 0x27c   : > { %2197 = vrsqrt.f32 %v436_v43 }
 0x289   : > { %v2198_v44 = vpop.eup %2197 }
 0x28a   : > { %v438_v46 = vmul.f32 %v2198_v44, %v430_v36 }
 0x28c   : > { %v443_v48 = vmul.f32 %v1820_v45, %v438_v46 }
 0x28e   : > { %v2496_v49 = vadd.f32 %v1821_v47, %v443_v48 }
 0x290   : > { %v469_v50 = vpack.c.bf16 %v2496_v49, %v2496_v49 }
 0x292   : > { %1999 = vmatmul.mubr.msk.bf16.vlgmr.msra.gmra.mxu1 %vm424_vm4, %v469_v50 }
 0x293   : > { %2004 = vmatprep.mubr.msk.bf16.mxu1 %vm2295_vm1, %v2294_v2 }
 0x352   : > { %v524_v52 = vpop.f32.mrf.mxu1 }
 0x353   : > { %v525_v53 = vadd.f32 %v1822_v51, %v524_v52 }
 0x354   : > { %v2000_v54 = vpop.f32.mrf.mxu1 }
 0x355   : > { %v2506_v55 = vpack.c.bf16 %v525_v53, %v525_v53 }
 0x356   : > { %v527_v56 = vpop.f32.mrf.mxu1 }
 0x357   : > { %532 = vrot.lane.b32.xlu1 %v2506_v55, %s2296_s26 }
 0x358   : > { %v2001_v57 = vpop.f32.mrf.mxu1 }
 0x3c9   : > { %v533_v58 = vpop.permute.xlu1 %532 }
 0x3ca   : > { %v539_v59 = vsel %vm534_vm5, %v533_v58, 0 }
 0x3cb   : > { %2003 = vmatpush3.bf16.xpose.msra.mxu1 %v539_v59 }
 0x3cc   : > { %2008 = vmatprep.subr.bf16.mxu1 %v2294_v2 }
 0x3d2   : > { %2005 = vmatmul.mubr.msk.bf16.vlgmr.msra.gmra.mxu1 %vm534_vm5, %v2506_v55 }
 0x3d3   : > { %2010 = vmatprep.mubr.msk.bf16.mxu1 %vm2295_vm1, %v2294_v2 }
 0x492   : > { %v575_v60 = vpop.f32.mrf.mxu1 }
 0x493   : > { %v581_v61 = vmul.f32 0.25, %v575_v60 }
 0x494   : > { %v2006_v62 = vpop.f32.mrf.mxu1 }
 0x495   : > { %v588_v63 = vadd.f32 %v2440_v18, %v581_v61 }
 0x496   : > { %v578_v0 = vpop.f32.mrf.mxu1 }
 0x497   : > { %v590_v1 = vsel %vm589_vm6, %v588_v63, -inf }
 0x498   : > { %591 = vmax.xlane.f32.xlu1 %v590_v1  ;;  %v2007_v3 = vpop.f32.mrf.mxu1 }
 0x4a9   : > { %653 = vrot.lane.b32.xlu1 %v2506_v55, %s2297_s10 }
 0x521   : > { %v592_v4 = vpop.xlane.xlu1 %591 }
 0x522   : > { %v593_v5 = vsub.f32 %v588_v63, %v592_v4 }
 0x524   : > { %v594_v6 = vmul.f32 1.442695, %v593_v5  ;;  %v2181_v5 = vld [vmem:[%s2780_s3 + $0x14] ss:$8 sps:$4 sm:$0xff]  }
 0x525   : > { %v654_v14 = vpop.permute.xlu1 %653 }
 0x526   : > { %2199 = vpow2.f32 %v594_v6  ;;  %v659_v16 = vsel %vm534_vm5, %v654_v14, 0 }
 0x533   : > { %v2200_v7 = vpop.eup %2199 }
 0x534   : > { %v596_v8 = vsel %vm589_vm6, %v2200_v7, 0.0 }
 0x535   : > { %597 = vadd.xlane.f32.xlu0 %v596_v8 }
 0x54b   : > { %602 = vrot.lane.b32.xlu0 %v2506_v55, %s2298_s12 }
 0x54f   : > { %651 = vrot.lane.b32.xlu0 %v2506_v55, %s2299_s13 }
 0x5be   : > { %v598_v9 = vpop.xlane.xlu0 %597 }
 0x5bf   : > { %2201 = vrcp.f32 %v598_v9 }
 0x5c2   : > { %v603_v10 = vpop.permute.xlu0 %602 }
 0x5c3   : > { %v608_v11 = vsel %vm342_vm0, %v603_v10, 0  ;;  %v1833_v10 = vld [vmem:[%s2782_s5 + $0x2] ss:$0 sm:$0xff] }
 0x5c4   : > { %2009 = vmatpush3.bf16.msra.mxu1 %v608_v11 }
 0x5c5   : > { %2014 = vmatprep.subr.bf16.mxu1 %v2294_v2 }
 0x5c6   : > { %v652_v17 = vpop.permute.xlu0 %651 }
 0x5cc   : > { %v2202_v12 = vpop.eup %2201 }
 0x5cd   : > { %v600_v13 = vmul.f32 %v2202_v12, %v2200_v7  ;;  %v1834_v12 = vld [vmem:[%s2782_s5 + $0x3] ss:$0 sm:$0xff] }
 0x5cf   : > { %v601_v15 = vpack.c.bf16 %v600_v13, %v600_v13 }
 0x5d1   : > { %2011 = vmatmul.mubr.msk.bf16.vlgmr.msra.gmra.mxu1 %vm589_vm6, %v601_v15 }
 0x5d2   : > { %2015 = vmatpush3.bf16.xpose.msra.mxu1 %v659_v16  ;;  %2016 = vmatprep.mubr.msk.bf16.mxu1 %vm2295_vm1, %v2294_v2  ;;  %v2183_v16 = vld [vmem:[%s2781_s4 + $0x18] sm:$0xff]  }
 0x5d3   : > { %2032 = vmatprep.subr.bf16.mxu1 %v2294_v2 }
 0x5d9   : > { %2017 = vmatmul.mubr.msk.bf16.vlgmr.msra.gmra.mxu1 %vm534_vm5, %v652_v17  ;;  %v2184_v17 = vld [vmem:[%s2781_s4 + $0x10] sm:$0xff]  }
 0x5da   : > { %2034 = vmatprep.mubr.msk.bf16.mxu1 %vm2295_vm1, %v2294_v2 }
 0x691   : > { %v644_v19 = vpop.f32.mrf.mxu1 }
 0x692   : > { %v650_v36 = vpack.c.bf16 %v644_v19, %v644_v19  ;;  %v2185_v19 = vld [vmem:[%s2781_s4 + $0x8] sm:$0xff]  }
 0x693   : > { %v2012_v20 = vpop.f32.mrf.mxu1 }
 0x694   : > { %v2186_v20 = vld [vmem:[%s2781_s4] sm:$0xff]  }
 0x695   : > { %v647_v21 = vpop.f32.mrf.mxu1 }
 0x696   : > { %v1835_v21 = vld [vmem:[%s2782_s5 + $0x4] ss:$0 sm:$0xff] }
 0x697   : > { %v2013_v22 = vpop.f32.mrf.mxu1 }
 0x699   : > { %v695_v23 = vpop.f32.mrf.mxu1 }
 0x69a   : > { %v701_v24 = vmul.f32 0.25, %v695_v23 }
 0x69b   : > { %v2018_v25 = vpop.f32.mrf.mxu1 }
 0x69c   : > { %v702_v26 = vadd.f32 %v701_v24, %v2440_v18 }
 0x69d   : > { %v698_v27 = vpop.f32.mrf.mxu1 }
 0x69e   : > { %v703_v28 = vsel %vm589_vm6, %v702_v26, -inf }
 0x69f   : > { %704 = vmax.xlane.f32.xlu0 %v703_v28  ;;  %v2019_v29 = vpop.f32.mrf.mxu1 }
 0x6b5   : > { %715 = vrot.lane.b32.xlu0 %v2506_v55, %s2786_s17  ;;  %v1832_v55 = vld [vmem:[%s2782_s5 + $0x1] ss:$0 sm:$0xff]  ;;  %s306_s17 = scalar_lea.vmem [#allocation2], %s305_s21 }
 0x6b6   : > { %s1747_s24 = sshll.u32 %s306_s17, 4  ;;  %s1748_s24 = int_to_ptr.vmem [resolvable:$true] %s1747_s24 }
 0x6b9   : > { %810 = vrot.lane.b32.xlu0 %v2485_v40, %s2301_s18 }
 0x728   : > { %v705_v30 = vpop.xlane.xlu0 %704 }
 0x729   : > { %v706_v31 = vsub.f32 %v702_v26, %v705_v30 }
 0x72b   : > { %v707_v32 = vmul.f32 1.442695, %v706_v31 }
 0x72c   : > { %v716_v33 = vpop.permute.xlu0 %715 }
 0x72d   : > { %2203 = vpow2.f32 %v707_v32  ;;  %v721_v34 = vsel %vm342_vm0, %v716_v33, 0 }
 0x72e   : > { %2021 = vmatpush3.bf16.msra.mxu0 %v721_v34 }
 0x72f   : > { %2026 = vmatprep.subr.bf16.mxu0 %v2294_v2 }
 0x730   : > { %v811_v35 = vpop.permute.xlu0 %810 }
 0x731   : > { %2033 = vmatpush3.bf16.msra.mxu1 %v811_v35 }
 0x732   : > { %2046 = vmatprep.subr.bf16.mxu1 %v2294_v2 }
 0x734   : > { %2035 = vmatmul.mubr.msk.bf16.vlgmr.msra.gmra.mxu1 %vm534_vm5, %v650_v36 }
 0x735   : > { %2054 = vmatprep.mubr.msk.bf16.mxu1 %vm2295_vm1, %v2294_v2  ;;  %2047 = vmatpush3.bf16.msra.mxu1 %v2183_v16 }
 0x736   : > { %2048 = vmatprep.subr.bf16.mxu1 %v2294_v2 }
 0x739   : > { %2049 = vmatpush3.bf16.msra.mxu1 %v2184_v17 }
 0x73a   : > { %v2204_v37 = vpop.eup %2203  ;;  %2050 = vmatprep.subr.bf16.mxu1 %v2294_v2 }
 0x73b   : > { %v709_v38 = vsel %vm589_vm6, %v2204_v37, 0.0 }
 0x73c   : > { %710 = vadd.xlane.f32.xlu1 %v709_v38 }
 0x73d   : > { %2051 = vmatpush3.bf16.msra.mxu1 %v2185_v19 }
 0x73e   : > { %2052 = vmatprep.subr.bf16.mxu1 %v2294_v2 }
 0x741   : > { %2053 = vmatpush3.bf16.msra.mxu1 %v2186_v20 }
 0x742   : > { %2072 = vmatprep.subr.bf16.mxu1 %v2294_v2 }
 0x74d   : > { %764 = vrot.lane.b32.xlu1 %v2479_v39, %s2301_s18 }
 0x7c5   : > { %v711_v40 = vpop.xlane.xlu1 %710 }
 0x7c6   : > { %2205 = vrcp.f32 %v711_v40 }
 0x7c9   : > { %v765_v44 = vpop.permute.xlu1 %764 }
 0x7d3   : > { %v2206_v41 = vpop.eup %2205 }
 0x7d4   : > { %v713_v42 = vmul.f32 %v2206_v41, %v2204_v37  ;;  %v1839_v37 = vld [vmem:[%s2782_s5 + $0x5] ss:$0 sm:$0xff] }
 0x7d6   : > { %v714_v43 = vpack.c.bf16 %v713_v42, %v713_v42 }
 0x7d8   : > { %2023 = vmatmul.mubr.msk.bf16.vlgmr.msra.gmra.mxu0 %vm589_vm6, %v714_v43 }
 0x7d9   : > { %2027 = vmatpush3.bf16.msra.mxu0 %v765_v44  ;;  %2028 = vmatprep.mubr.msk.bf16.mxu0 %vm2295_vm1, %v2294_v2 }
 0x7da   : > { %2038 = vmatprep.subr.bf16.mxu0 %v2294_v2 }
 0x7f4   : > { %v850_v45 = vpop.f32.mrf.mxu1 }
 0x7f6   : > { %v2036_v46 = vpop.f32.mrf.mxu1 }
 0x7f8   : > { %v853_v47 = vpop.f32.mrf.mxu1 }
 0x7fa   : > { %v2037_v48 = vpop.f32.mrf.mxu1 }
 0x898   : > { %v757_v50 = vpop.f32.mrf.mxu0 }
 0x899   : > { %v763_v39 = vpack.c.bf16 %v757_v50, %v757_v50 }
 0x89a   : > { %v2024_v51 = vpop.f32.mrf.mxu0 }
 0x89b   : > { %2029 = vmatmul.mubr.msk.bf16.vlgmr.msra.gmra.mxu0 %vm534_vm5, %v763_v39  ;;  %v2187_v51 = vld [vmem:[%s2780_s3 + $0x30] ss:$8 sps:$4 sm:$0xff]  }
 0x89c   : > { %v760_v52 = vpop.f32.mrf.mxu0  ;;  %2042 = vmatprep.mubr.msk.bf16.mxu0 %vm2295_vm1, %v2294_v2  ;;  %2039 = vmatpush3.bf16.msra.mxu0 %v2181_v5 }
 0x89d   : > { %2040 = vmatprep.subr.bf16.mxu0 %v2294_v2  ;;  %v2188_v52 = vld [vmem:[%s2780_s3 + $0x20] ss:$8 sps:$4 sm:$0xff]  }
 0x89e   : > { %v2025_v53 = vpop.f32.mrf.mxu0 }
 0x95b   : > { %v804_v54 = vpop.f32.mrf.mxu0 }
 0x95c   : > { %v851_v56 = vadd.f32 %v850_v45, %v804_v54 }
 0x95d   : > { %v2030_v57 = vpop.f32.mrf.mxu0 }
 0x95e   : > { %v861_v58 = vadd.f32 %v1832_v55, %v851_v56  ;;  %v1845_v57 = vld [vmem:[%s2782_s5 + $0x6] ss:$0 sm:$0xff] }
 0x95f   : > { %v807_v59 = vpop.f32.mrf.mxu0 }
 0x960   : > { %v862_v60 = vadd.f32 %v861_v58, %v2496_v49  ;;  %v2182_v49 = vld [vmem:[%s2780_s3 + $0x4] ss:$8 sps:$4 sm:$0xff]  }
 0x961   : > { %v2031_v61 = vpop.f32.mrf.mxu0  ;;  %2041 = vmatpush3.bf16.msra.mxu0 %v2182_v49  ;;  %v1846_v59 = vld [vmem:[%s2782_s5 + $0x7] ss:$0 sm:$0xff] }
 0x962   : > { %v865_v62 = vsel %vm424_vm4, %v862_v60, 0.0  ;;  %2058 = vmatprep.subr.bf16.mxu0 %v2294_v2 }
 0x963   : > { %866 = vadd.xlane.f32.xlu0 %v865_v62 }
 0x9ec   : > { %v867_v63 = vpop.xlane.xlu0 %866 }
 0x9ed   : > { %v868_v0 = vmul.f32 0.03125, %v867_v63  ;;  %v1864_v63 = vld [vmem:[%s2782_s5 + $0x8] ss:$0 sm:$0xff] }
 0x9ef   : > { %v869_v1 = vsub.f32 %v862_v60, %v868_v0 }
 0x9f1   : > { %v870_v3 = vmul.f32 %v869_v1, %v869_v1 }
 0x9f3   : > { %v871_v4 = vsel %vm424_vm4, %v870_v3, 0.0 }
 0x9f4   : > { %872 = vadd.xlane.f32.xlu1 %v871_v4 }
 0xa7d   : > { %v873_v6 = vpop.xlane.xlu1 %872 }
 0xa7e   : > { %v874_v7 = vmul.f32 0.03125, %v873_v6 }
 0xa80   : > { %v875_v8 = vadd.f32 1e-12, %v874_v7 }
 0xa82   : > { %2207 = vrsqrt.f32 %v875_v8 }
 0xa8f   : > { %v2208_v9 = vpop.eup %2207 }
 0xa90   : > { %v877_v11 = vmul.f32 %v2208_v9, %v869_v1 }
 0xa92   : > { %v882_v13 = vmul.f32 %v1833_v10, %v877_v11 }
 0xa94   : > { %v887_v14 = vadd.f32 %v1834_v12, %v882_v13 }
 0xa96   : > { %v888_v15 = vpack.c.bf16 %v887_v14, %v887_v14 }
 0xa98   : > { %2043 = vmatmul.mubr.msk.bf16.vlgmr.msra.gmra.mxu0 %vm424_vm4, %v888_v15 }
 0xa99   : > { %2062 = vmatprep.mubr.msk.bf16.mxu0 %vm2295_vm1, %v2294_v2  ;;  %2059 = vmatpush3.bf16.msra.mxu0 %v2187_v51 }
 0xa9a   : > { %2060 = vmatprep.subr.bf16.mxu0 %v2294_v2 }
 0xa9d   : > { %2061 = vmatpush3.bf16.msra.mxu0 %v2188_v52 }
 0xa9e   : > { %2066 = vmatprep.subr.bf16.mxu0 %v2294_v2 }
 0xb58   : > { %v943_v22 = vpop.f32.mrf.mxu0 }
 0xb59   : > { %v944_v23 = vadd.f32 %v1835_v21, %v943_v22 }
 0xb5a   : > { %v2044_v24 = vpop.f32.mrf.mxu0 }
 0xb5b   : > { %v950_v25 = vmul.f32 0.044715, %v944_v23  ;;  %v949_v33 = vmul.f32 0.5, %v944_v23 }
 0xb5c   : > { %v946_v26 = vpop.f32.mrf.mxu0 }
 0xb5d   : > { %v951_v27 = vmul.f32 %v950_v25, %v944_v23 }
 0xb5e   : > { %v2045_v28 = vpop.f32.mrf.mxu0 }
 0xb5f   : > { %v952_v29 = vmul.f32 %v951_v27, %v944_v23 }
 0xb61   : > { %v953_v30 = vadd.f32 %v952_v29, %v944_v23 }
 0xb63   : > { %v954_v31 = vmul.f32 0.7978846, %v953_v30 }
 0xb65   : > { %2209 = vtanh.f32 %v954_v31 }
 0xb72   : > { %v2210_v32 = vpop.eup %2209 }
 0xb73   : > { %v956_v34 = vadd.f32 1.0, %v2210_v32 }
 0xb75   : > { %v957_v35 = vmul.f32 %v956_v34, %v949_v33 }
 0xb77   : > { %v958_v36 = vpack.c.bf16 %v957_v35, %v957_v35 }
 0xb79   : > { %2055 = vmatmul.mubr.msk.bf16.vlgmr.msra.gmra.mxu1 %vm988_vm7, %v958_v36 }
 0xb7a   : > { %2074 = vmatprep.mubr.msk.bf16.mxu1 %vm2295_vm1, %v2294_v2 }
 0xc39   : > { %v1026_v38 = vpop.f32.mrf.mxu1 }
 0xc3a   : > { %v1027_v40 = vadd.f32 %v1839_v37, %v1026_v38 }
 0xc3b   : > { %v2056_v41 = vpop.f32.mrf.mxu1 }
 0xc3c   : > { %v1032_v42 = vadd.f32 %v1027_v40, %v887_v14 }
 0xc3d   : > { %v1029_v43 = vpop.f32.mrf.mxu1 }
 0xc3e   : > { %v1035_v44 = vsel %vm424_vm4, %v1032_v42, 0.0 }
 0xc3f   : > { %1036 = vadd.xlane.f32.xlu0 %v1035_v44  ;;  %v2057_v45 = vpop.f32.mrf.mxu1 }
 0xcc8   : > { %v1037_v46 = vpop.xlane.xlu0 %1036 }
 0xcc9   : > { %v1038_v47 = vmul.f32 0.03125, %v1037_v46 }
 0xccb   : > { %v1039_v48 = vsub.f32 %v1032_v42, %v1038_v47 }
 0xccd   : > { %v1040_v50 = vmul.f32 %v1039_v48, %v1039_v48 }
 0xccf   : > { %v1041_v39 = vsel %vm424_vm4, %v1040_v50, 0.0 }
 0xcd0   : > { %1042 = vadd.xlane.f32.xlu0 %v1041_v39 }
 0xd59   : > { %v1043_v53 = vpop.xlane.xlu0 %1042 }
 0xd5a   : > { %v1044_v54 = vmul.f32 0.03125, %v1043_v53 }
 0xd5c   : > { %v1045_v55 = vadd.f32 1e-12, %v1044_v54 }
 0xd5e   : > { %2211 = vrsqrt.f32 %v1045_v55 }
 0xd6b   : > { %v2212_v56 = vpop.eup %2211 }
 0xd6c   : > { %v1047_v58 = vmul.f32 %v2212_v56, %v1039_v48 }
 0xd6e   : > { %v1052_v60 = vmul.f32 %v1845_v57, %v1047_v58 }
 0xd70   : > { %v2621_v61 = vadd.f32 %v1846_v59, %v1052_v60 }
 0xd72   : > { %v1076_v62 = vpack.c.bf16 %v2621_v61, %v2621_v61 }
 0xd74   : > { %2063 = vmatmul.mubr.msk.bf16.vlgmr.msra.gmra.mxu0 %vm424_vm4, %v1076_v62 }
 0xd75   : > { %2068 = vmatprep.mubr.msk.bf16.mxu0 %vm2295_vm1, %v2294_v2 }
 0xe34   : > { %v1132_v0 = vpop.f32.mrf.mxu0 }
 0xe35   : > { %v1133_v1 = vadd.f32 %v1864_v63, %v1132_v0 }
 0xe36   : > { %v2064_v3 = vpop.f32.mrf.mxu0 }
 0xe37   : > { %v1138_v4 = vpack.c.bf16 %v1133_v1, %v1133_v1  ;;  %v1875_v3 = vld [vmem:[%s2782_s5 + $0x9] ss:$0 sm:$0xff] }
 0xe38   : > { %v1135_v5 = vpop.f32.mrf.mxu0 }
 0xe39   : > { %1253 = vrot.lane.b32.xlu1 %v1138_v4, %s2297_s10  ;;  %1140 = vrot.lane.b32.xlu0 %v1138_v4, %s2296_s26  ;;  %s2789_s26 = smov 48   ;;  %s1735_s10 = scalar_lea.sflag [#allocation3], %s305_s21 }
 0xe3a   : > { %v2065_v49 = vpop.f32.mrf.mxu0 }
 0xe3d   : > { %1251 = vrot.lane.b32.xlu1 %v1138_v4, %s2299_s13  ;;  %s2302_s13 = smov [#allocation2]  }
 0xeab   : > { %v1141_v6 = vpop.permute.xlu0 %1140  ;;  %v1254_v8 = vpop.permute.xlu1 %1253 }
 0xeac   : > { %v1146_v7 = vsel %vm534_vm5, %v1141_v6, 0  ;;  %v1259_v9 = vsel %vm534_vm5, %v1254_v8, 0 }
 0xead   : > { %2067 = vmatpush3.bf16.xpose.msra.mxu0 %v1146_v7 }
 0xeae   : > { %2078 = vmatprep.subr.bf16.mxu0 %v2294_v2 }
 0xeaf   : > { %v1252_v10 = vpop.permute.xlu1 %1251 }
 0xeb4   : > { %2069 = vmatmul.mubr.msk.bf16.vlgmr.msra.gmra.mxu0 %vm534_vm5, %v1138_v4 }
 0xeb5   : > { %2079 = vmatpush3.bf16.xpose.msra.mxu0 %v1259_v9  ;;  %2080 = vmatprep.mubr.msk.bf16.mxu0 %vm2295_vm1, %v2294_v2 }
 0xeb6   : > { %2090 = vmatprep.subr.bf16.mxu0 %v2294_v2 }
 0xebc   : > { %2081 = vmatmul.mubr.msk.bf16.vlgmr.msra.gmra.mxu0 %vm534_vm5, %v1252_v10 }
 0xebd   : > { %2092 = vmatprep.mubr.msk.bf16.mxu0 %vm2295_vm1, %v2294_v2 }
 0xf74   : > { %v1182_v11 = vpop.f32.mrf.mxu0 }
 0xf75   : > { %v1188_v12 = vmul.f32 0.25, %v1182_v11 }
 0xf76   : > { %v2070_v13 = vpop.f32.mrf.mxu0 }
 0xf77   : > { %v1189_v14 = vadd.f32 %v1188_v12, %v2440_v18 }
 0xf78   : > { %v1185_v15 = vpop.f32.mrf.mxu0 }
 0xf79   : > { %v1190_v16 = vsel %vm589_vm6, %v1189_v14, -inf  ;;  %v2189_v15 = vld [vmem:[%s2780_s3 + $0x34] ss:$8 sps:$4 sm:$0xff]  }
 0xf7a   : > { %1191 = vmax.xlane.f32.xlu0 %v1190_v16  ;;  %v2071_v17 = vpop.f32.mrf.mxu0 }
 0xf7c   : > { %v1295_v19 = vpop.f32.mrf.mxu0 }
 0xf7d   : > { %v1301_v20 = vmul.f32 0.25, %v1295_v19 }
 0xf7e   : > { %v2082_v21 = vpop.f32.mrf.mxu0 }
 0xf7f   : > { %v1302_v22 = vadd.f32 %v1301_v20, %v2440_v18  ;;  %v1878_v21 = vld [vmem:[%s2782_s5 + $0xa] ss:$0 sm:$0xff] }
 0xf80   : > { %v1298_v23 = vpop.f32.mrf.mxu0 }
 0xf81   : > { %v1303_v24 = vsel %vm589_vm6, %v1302_v22, -inf  ;;  %v1879_v23 = vld [vmem:[%s2782_s5 + $0xb] ss:$0 sm:$0xff] }
 0xf82   : > { %1304 = vmax.xlane.f32.xlu1 %v1303_v24  ;;  %v2083_v25 = vpop.f32.mrf.mxu0 }
 0xf93   : > { %1202 = vrot.lane.b32.xlu1 %v1138_v4, %s2298_s12  ;;  %s2231_s12 = scalar_lea.vmem %s1748_s24, 16 }
 0xf94   : > { %p2232_p11 = scmp.ne.s32.totalorder %s1748_s24, %s2231_s12 }
 0xf96   : > { %p2233_p12 = pnand %p2232_p11, %p2386_p5 }
 0xf97   : > { %1364 = vrot.lane.b32.xlu1 %v2187_v51, %s2301_s18 }
 0xf98   : > { %p2234_p13 = pneg %p2233_p12 }
 0xf9b   : > { %1410 = vrot.lane.b32.xlu1 %v2188_v52, %s2301_s18  ;;  %s2235_s18 = sshll.u32 %s2302_s13, 4  ;;  %s2236_s18 = int_to_ptr.vmem [resolvable:$false] %s2235_s18 }
 0xf9c   : > { %s2237_s9 = scalar_lea.vmem %s2236_s18, 32  ;;  %p2238_p0 = scmp.lt.s32.totalorder %s1748_s24, %s2236_s18 }
 0xf9d   : > { %p2239_p1 = scmp.lt.s32.totalorder %s2237_s9, %s2231_s12 }
 0xf9f   : > { %p2240_p2 = por %p2239_p1, %p2238_p0 }
 0xfa1   : > { %p2241_p3 = pnand %p2240_p2, %p2234_p13 }
0x1003   : > { %v1192_v26 = vpop.xlane.xlu0 %1191 }
0x1004   : > { %v1193_v27 = vsub.f32 %v1189_v14, %v1192_v26 }
0x1006   : > { %v1194_v28 = vmul.f32 1.442695, %v1193_v27  ;;  %v2191_v27 = vld [vmem:[%s2781_s4 + $0x38] sm:$0xff]  }
0x1008   : > { %2213 = vpow2.f32 %v1194_v28  ;;  %v2192_v28 = vld [vmem:[%s2781_s4 + $0x30] sm:$0xff]  }
0x100b   : > { %v1305_v29 = vpop.xlane.xlu1 %1304 }
0x100c   : > { %v1306_v30 = vsub.f32 %v1302_v22, %v1305_v29  ;;  %v2193_v29 = vld [vmem:[%s2781_s4 + $0x28] sm:$0xff]  }
0x100e   : > { %v1307_v31 = vmul.f32 1.442695, %v1306_v30  ;;  %v2194_v30 = vld [vmem:[%s2781_s4 + $0x20] sm:$0xff]  }
0x100f   : > { %v1203_v32 = vpop.permute.xlu1 %1202 }
0x1010   : > { %2215 = vpow2.f32 %v1307_v31  ;;  %v1208_v18 = vsel %vm342_vm0, %v1203_v32, 0  ;;  %v1881_v31 = vld [vmem:[%s2782_s5 + $0xc] ss:$0 sm:$0xff] }
0x1011   : > { %2073 = vmatpush3.bf16.msra.mxu1 %v1208_v18 }
0x1012   : > { %2084 = vmatprep.subr.bf16.mxu1 %v2294_v2 }
0x1013   : > { %v1365_v37 = vpop.permute.xlu1 %1364 }
0x1014   : > { %2091 = vmatpush3.bf16.msra.mxu0 %v1365_v37 }
0x1015   : > { %v2214_v33 = vpop.eup %2213  ;;  %2102 = vmatprep.subr.bf16.mxu0 %v2294_v2 }
0x1016   : > { %v1196_v34 = vsel %vm589_vm6, %v2214_v33, 0.0 }
0x1017   : > { %1197 = vadd.xlane.f32.xlu0 %v1196_v34  ;;  %v1411_v50 = vpop.permute.xlu1 %1410 }
0x101d   : > { %v2216_v35 = vpop.eup %2215 }
0x101e   : > { %v1309_v36 = vsel %vm589_vm6, %v2216_v35, 0.0 }
0x101f   : > { %1310 = vadd.xlane.f32.xlu0 %v1309_v36 }
0x1035   : > { %1315 = vrot.lane.b32.xlu0 %v1138_v4, %s2789_s26  ;;  %s2742_s26 = scalar_lea.hbm %s2785_s8, %s1899_s23 }
0x10a0   : > { %v1198_v38 = vpop.xlane.xlu0 %1197 }
0x10a1   : > { %2217 = vrcp.f32 %v1198_v38 }
0x10a8   : > { %v1311_v40 = vpop.xlane.xlu0 %1310 }
0x10a9   : > { %2219 = vrcp.f32 %v1311_v40 }
0x10ac   : > { %v1316_v43 = vpop.permute.xlu0 %1315 }
0x10ad   : > { %v1321_v45 = vsel %vm342_vm0, %v1316_v43, 0 }
0x10ae   : > { %v2218_v41 = vpop.eup %2217 }
0x10af   : > { %v1200_v42 = vmul.f32 %v2218_v41, %v2214_v33 }
0x10b1   : > { %v1201_v44 = vpack.c.bf16 %v1200_v42, %v1200_v42 }
0x10b3   : > { %2075 = vmatmul.mubr.msk.bf16.vlgmr.msra.gmra.mxu1 %vm589_vm6, %v1201_v44 }
0x10b4   : > { %2085 = vmatpush3.bf16.msra.mxu1 %v1321_v45  ;;  %2086 = vmatprep.mubr.msk.bf16.mxu1 %vm2295_vm1, %v2294_v2 }
0x10b5   : > { %2096 = vmatprep.subr.bf16.mxu1 %v2294_v2 }
0x10b6   : > { %v2220_v46 = vpop.eup %2219 }
0x10b7   : > { %v1313_v47 = vmul.f32 %v2220_v46, %v2216_v35 }
0x10b9   : > { %v1314_v48 = vpack.c.bf16 %v1313_v47, %v1313_v47  ;;  %v1886_v47 = vld [vmem:[%s2782_s5 + $0xd] ss:$0 sm:$0xff] }
0x10bb   : > { %2087 = vmatmul.mubr.msk.bf16.vlgmr.msra.gmra.mxu1 %vm589_vm6, %v1314_v48 }
0x10bc   : > { %2097 = vmatpush3.bf16.msra.mxu1 %v1411_v50  ;;  %2098 = vmatprep.mubr.msk.bf16.mxu1 %vm2295_vm1, %v2294_v2 }
0x10bd   : > { %2110 = vmatprep.subr.bf16.mxu1 %v2294_v2 }
0x1173   : > { %v1244_v39 = vpop.f32.mrf.mxu1 }
0x1174   : > { %v1250_v51 = vpack.c.bf16 %v1244_v39, %v1244_v39 }
0x1175   : > { %v2076_v52 = vpop.f32.mrf.mxu1 }
0x1176   : > { %2099 = vmatmul.mubr.msk.bf16.vlgmr.msra.gmra.mxu1 %vm534_vm5, %v1250_v51 }
0x1177   : > { %v1247_v53 = vpop.f32.mrf.mxu1  ;;  %2118 = vmatprep.mubr.msk.bf16.mxu1 %vm2295_vm1, %v2294_v2  ;;  %2111 = vmatpush3.bf16.msra.mxu1 %v2191_v27 }
0x1178   : > { %2112 = vmatprep.subr.bf16.mxu1 %v2294_v2 }
0x1179   : > { %v2077_v54 = vpop.f32.mrf.mxu1 }
0x117b   : > { %v1357_v55 = vpop.f32.mrf.mxu1  ;;  %2113 = vmatpush3.bf16.msra.mxu1 %v2192_v28 }
0x117c   : > { %v1363_v56 = vpack.c.bf16 %v1357_v55, %v1357_v55  ;;  %2114 = vmatprep.subr.bf16.mxu1 %v2294_v2 }
0x117d   : > { %v2088_v57 = vpop.f32.mrf.mxu1 }
0x117e   : > { %2093 = vmatmul.mubr.msk.bf16.vlgmr.msra.gmra.mxu0 %vm534_vm5, %v1363_v56 }
0x117f   : > { %v1360_v58 = vpop.f32.mrf.mxu1  ;;  %2106 = vmatprep.mubr.msk.bf16.mxu0 %vm2295_vm1, %v2294_v2  ;;  %2103 = vmatpush3.bf16.msra.mxu0 %v2189_v15 }
0x1180   : > { %2104 = vmatprep.subr.bf16.mxu0 %v2294_v2  ;;  %2115 = vmatpush3.bf16.msra.mxu1 %v2193_v29 }
0x1181   : > { %v2089_v59 = vpop.f32.mrf.mxu1  ;;  %2116 = vmatprep.subr.bf16.mxu1 %v2294_v2 }
0x1184   : > { %2117 = vmatpush3.bf16.msra.mxu1 %v2194_v30 }
0x1236   : > { %v1450_v60 = vpop.f32.mrf.mxu1 }
0x1238   : > { %v2100_v62 = vpop.f32.mrf.mxu1 }
0x1239   : > { %v2196_v62 = vld [vmem:[%s2783_s6] sm:$0xff]  }
0x123a   : > { %v1453_v63 = vpop.f32.mrf.mxu1 }
0x123c   : > { %v2101_v0 = vpop.f32.mrf.mxu1 }
0x123e   : > { %v1404_v1 = vpop.f32.mrf.mxu0 }
0x123f   : > { %v1451_v4 = vadd.f32 %v1450_v60, %v1404_v1  ;;  %v2195_v60 = vld [vmem:[%s2783_s6 + $0x8] sm:$0xff]  }
0x1240   : > { %v2094_v5 = vpop.f32.mrf.mxu0 }
0x1241   : > { %v1461_v49 = vadd.f32 %v1875_v3, %v1451_v4  ;;  %v1894_v4 = vld [vmem:[%s2782_s5 + $0xe] ss:$0 sm:$0xff] }
0x1242   : > { %v1407_v6 = vpop.f32.mrf.mxu0 }
0x1243   : > { %v1462_v7 = vadd.f32 %v1461_v49, %v2621_v61  ;;  %v2190_v61 = vld [vmem:[%s2780_s3 + $0x24] ss:$8 sps:$4 sm:$0xff]  }
0x1244   : > { %v2095_v8 = vpop.f32.mrf.mxu0  ;;  %2105 = vmatpush3.bf16.msra.mxu0 %v2190_v61  ;;  %v1895_v49 = vld [vmem:[%s2782_s5 + $0xf] ss:$0 sm:$0xff]  ;;  %v1671_v61 = vld [vmem:[%s2784_s7] sm:$0x1] }
0x1245   : > { %v1465_v9 = vsel %vm424_vm4, %v1462_v7, 0.0  ;;  %2122 = vmatprep.subr.bf16.mxu0 %v2294_v2 }
0x1246   : > { %1466 = vadd.xlane.f32.xlu0 %v1465_v9 }
0x12cf   : > { %v1467_v10 = vpop.xlane.xlu0 %1466 }
0x12d0   : > { %v1468_v11 = vmul.f32 0.03125, %v1467_v10 }
0x12d2   : > { %v1469_v12 = vsub.f32 %v1462_v7, %v1468_v11 }
0x12d4   : > { %v1470_v13 = vmul.f32 %v1469_v12, %v1469_v12 }
0x12d6   : > { %v1471_v14 = vsel %vm424_vm4, %v1470_v13, 0.0 }
0x12d7   : > { %1472 = vadd.xlane.f32.xlu1 %v1471_v14 }
0x1360   : > { %v1473_v16 = vpop.xlane.xlu1 %1472 }
0x1361   : > { %v1474_v17 = vmul.f32 0.03125, %v1473_v16 }
0x1363   : > { %v1475_v19 = vadd.f32 1e-12, %v1474_v17 }
0x1365   : > { %2221 = vrsqrt.f32 %v1475_v19 }
0x1372   : > { %v2222_v20 = vpop.eup %2221 }
0x1373   : > { %v1477_v22 = vmul.f32 %v2222_v20, %v1469_v12 }
0x1375   : > { %v1482_v24 = vmul.f32 %v1878_v21, %v1477_v22 }
0x1377   : > { %v1487_v25 = vadd.f32 %v1879_v23, %v1482_v24 }
0x1379   : > { %v1488_v26 = vpack.c.bf16 %v1487_v25, %v1487_v25 }
0x137b   : > { %2107 = vmatmul.mubr.msk.bf16.vlgmr.msra.gmra.mxu0 %vm424_vm4, %v1488_v26 }
0x137c   : > { %2126 = vmatprep.mubr.msk.bf16.mxu0 %vm2295_vm1, %v2294_v2  ;;  %2123 = vmatpush3.bf16.msra.mxu0 %v2195_v60 }
0x137d   : > { %2124 = vmatprep.subr.bf16.mxu0 %v2294_v2 }
0x1380   : > { %2125 = vmatpush3.bf16.msra.mxu0 %v2196_v62 }
0x143b   : > { %v1543_v32 = vpop.f32.mrf.mxu0 }
0x143c   : > { %v1544_v18 = vadd.f32 %v1881_v31, %v1543_v32 }
0x143d   : > { %v2108_v33 = vpop.f32.mrf.mxu0 }
0x143e   : > { %v1550_v34 = vmul.f32 0.044715, %v1544_v18  ;;  %v1549_v43 = vmul.f32 0.5, %v1544_v18 }
0x143f   : > { %v1546_v35 = vpop.f32.mrf.mxu0 }
0x1440   : > { %v1551_v36 = vmul.f32 %v1550_v34, %v1544_v18 }
0x1441   : > { %v2109_v37 = vpop.f32.mrf.mxu0 }
0x1442   : > { %v1552_v38 = vmul.f32 %v1551_v36, %v1544_v18 }
0x1444   : > { %v1553_v40 = vadd.f32 %v1552_v38, %v1544_v18 }
0x1446   : > { %v1554_v41 = vmul.f32 0.7978846, %v1553_v40 }
0x1448   : > { %2223 = vtanh.f32 %v1554_v41 }
0x1455   : > { %v2224_v42 = vpop.eup %2223 }
0x1456   : > { %v1556_v44 = vadd.f32 1.0, %v2224_v42 }
0x1458   : > { %v1557_v45 = vmul.f32 %v1556_v44, %v1549_v43 }
0x145a   : > { %v1558_v46 = vpack.c.bf16 %v1557_v45, %v1557_v45 }
0x145c   : > { %2119 = vmatmul.mubr.msk.bf16.vlgmr.msra.gmra.mxu1 %vm988_vm7, %v1558_v46 }
0x151c   : > { %v1625_v48 = vpop.f32.mrf.mxu1 }
0x151d   : > { %v1626_v50 = vadd.f32 %v1886_v47, %v1625_v48 }
0x151e   : > { %v2120_v39 = vpop.f32.mrf.mxu1 }
0x151f   : > { %v1631_v51 = vadd.f32 %v1626_v50, %v1487_v25 }
0x1520   : > { %v1628_v52 = vpop.f32.mrf.mxu1 }
0x1521   : > { %v1634_v53 = vsel %vm424_vm4, %v1631_v51, 0.0 }
0x1522   : > { %1635 = vadd.xlane.f32.xlu0 %v1634_v53  ;;  %v2121_v54 = vpop.f32.mrf.mxu1 }
0x15ab   : > { %v1636_v55 = vpop.xlane.xlu0 %1635 }
0x15ac   : > { %v1637_v56 = vmul.f32 0.03125, %v1636_v55 }
0x15ae   : > { %v1638_v57 = vsub.f32 %v1631_v51, %v1637_v56 }
0x15b0   : > { %v1639_v58 = vmul.f32 %v1638_v57, %v1638_v57 }
0x15b2   : > { %v1640_v59 = vsel %vm424_vm4, %v1639_v58, 0.0 }
0x15b3   : > { %1641 = vadd.xlane.f32.xlu0 %v1640_v59 }
0x163c   : > { %v1642_v63 = vpop.xlane.xlu0 %1641 }
0x163d   : > { %v1643_v0 = vmul.f32 0.03125, %v1642_v63 }
0x163f   : > { %v1644_v1 = vadd.f32 1e-12, %v1643_v0 }
0x1641   : > { %2225 = vrsqrt.f32 %v1644_v1 }
0x164e   : > { %v2226_v3 = vpop.eup %2225 }
0x164f   : > { %v1646_v5 = vmul.f32 %v2226_v3, %v1638_v57 }
0x1651   : > { %v1651_v6 = vmul.f32 %v1894_v4, %v1646_v5 }
0x1653   : > { %v1656_v7 = vadd.f32 %v1895_v49, %v1651_v6 }
0x1655   : > { %v1657_v8 = vsel %vm424_vm4, %v1656_v7, 0.0 }
0x1656   : > { %v1658_v2 = vrot.slane %v1657_v8, 4 }
0x1658   : > { %v1659_v9 = vadd.f32 %v1658_v2, %v1657_v8 }
0x165a   : > { %v1660_v10 = vrot.slane %v1659_v9, 2 }
0x165c   : > { %v1661_v11 = vadd.f32 %v1660_v10, %v1659_v9 }
0x165e   : > { %v1662_v12 = vrot.slane %v1661_v11, 1 }
0x1660   : > { %v1663_v13 = vadd.f32 %v1662_v12, %v1661_v11 }
0x1662   : > { %v1665_v14 = vmul.f32 0.125, %v1663_v13 }
0x1664   : > { %v1670_v15 = vpack.c.bf16 %v1665_v14, %v1665_v14 }
0x1666   : > { %2127 = vmatmul.mubr.msk.bf16.vlgmr.msra.gmra.mxu0 %vm424_vm4, %v1670_v15 }
0x1726   : > { %v1721_v16 = vpop.f32.mrf.mxu0 }
0x1727   : > { %v1722_v17 = vadd.f32 %v1721_v16, %v1671_v61 }
0x1728   : > { %v2128_v19 = vpop.f32.mrf.mxu0 }
0x1729   : > { %v1727_v20 = vsub.f32 0.0, %v1722_v17 }
0x172a   : > { %v1724_v21 = vpop.f32.mrf.mxu0 }
0x172b   : > { %v1728_v22 = vmul.f32 1.442695, %v1727_v20 }
0x172c   : > { %v2129_v23 = vpop.f32.mrf.mxu0 }
0x172d   : > { %2227 = vpow2.f32 %v1728_v22 }
0x173a   : > { %v2228_v24 = vpop.eup %2227 }
0x173b   : > { %v1730_v25 = vadd.f32 1.0, %v2228_v24 }
0x173d   : > { %2229 = vrcp.f32 %v1730_v25 }
0x174a   : > { %v2230_v26 = vpop.eup %2229 }
0x174b   : > { %1733 = vst [vmem:[%s306_s17] sm:$0x1] %v2230_v26 }
0x174c   : > { %2244 = shalt.err (!%p2241_p3)
}
0x174d   : > { %s2245_s20 = scalar_lea.hbm %s2742_s26, 16  ;;  %s2249_s23 = scalar_lea.hbm %s2785_s8, 32 }
0x174e   : > { %p2246_p4 = scmp.ne.s32.totalorder %s2742_s26, %s2245_s20  ;;  %p2250_p9 = scmp.lt.s32.totalorder %s2742_s26, %s2785_s8 }
0x174f   : > { %p2251_p10 = scmp.lt.s32.totalorder %s2249_s23, %s2245_s20 }
0x1750   : > { %p2247_p7 = pnand %p2246_p4, %p2386_p5 }
0x1751   : > { %p2252_p11 = por %p2251_p10, %p2250_p9 }
0x1752   : > { %p2248_p8 = pneg %p2247_p7 }
0x1754   : > { %p2253_p12 = pnand %p2252_p11, %p2248_p8 }
0x1756   : > { %2256 = shalt.err (!%p2253_p12)
}
0x1757   : > { %2130 = dma.vmem_to_hbm [thread:$0]  (%p2386_p5), %s1748_s24, 16, %s2742_s26, %s1735_s10  }
0x1758 PF: > { %p2136_p13 = scmp.ge.s32.totalorder %s2291_s30, 2  ;;  %s1759_s19 = sand.u32 1, %s2279_s27  }
0x1759   : > { %s1760_s12 = scalar_lea.sflag [#allocation3], %s1759_s19 }
0x175a   : > { %p2133_p0 = pnand %p2136_p13, %p2390_p6 }
0x175c   : > { %p2134_p1 = pneg %p2133_p0 }
0x175e   : > { %2274 = dma.done.wait (%p2134_p1), %s1760_s12, 16  }
0x175f   : > { %2276 = vsyncadd (%p2134_p1), %s1760_s12, 4294967280  ;;  %p18_p2 = scmp.ge.s32.totalorder %s2373_s11, 4   ;;  %s2790_s27 = smov %s2283_s28 }
0x1760   : > { %s2791_s28 = smov %s2287_s29  ;;  %s2792_s29 = smov %s2384_s14 }
0x1761   : > { %s2793_s30 = smov %s2373_s11  ;;  %20 = sbr.rel (!%p18_p2) target bundleno = 3 (0x3), region = 93 }
0x1766   :  { %1764 = vsyncpa [#allocation3], 1 }
0x1767   :  { %1766 = vsyncpa [#allocation3 + $0x1], 1 }

</bundles_post_ra>
